<compile_context>
chip_gen: v6e
topology: v6e:2x2x1
jax: 0.10.0
libtpu: 0.0.40
codegen_flags: <defaults>
</compile_context>

<pallas_src>
import jax
import jax.numpy as jnp
from jax import lax
from jax.experimental import pallas as pl
from jax.experimental.pallas import tpu as pltpu

# Small, fixed problem sizes (consistent with a 4-channel 16x16 input).
B, H, W = 2, 16, 16
CIN, C1, C2 = 4, 8, 8
K = 3                      # 3x3 convs, padding=1, stride=1
CP = 8                     # conv1 input channels zero-padded 4 -> 8 (full 8-sublane tap tiles)
N = B * H * W              # 512: flattened batch*spatial axis -> lives on the lane axis
LOG2_W = W.bit_length() - 1


def _shift_flat(x, s):
    """result[:, f] = x[:, f + s] for in-range f+s, zeros elsewhere. x: (c, N)."""
    c = x.shape[0]
    if s == 0:
        return x
    if s > 0:
        return jnp.concatenate([x[:, s:], jnp.zeros((c, s), x.dtype)], axis=1)
    return jnp.concatenate([jnp.zeros((c, -s), x.dtype), x[:, :s]], axis=1)


def _conv3x3_same_cm(x_cm, w_t, b_c):
    """3x3 / stride-1 / pad-1 conv in channel-major layout.

    x_cm: (c_in, N)       activations, N = B*H*W on lanes
    w_t : (c_out, 9*c_in) weights, tap-major (kh, kw) then input channel
    b_c : (c_out, 1)      bias
    returns (c_out, N) conv + bias (no activation)
    """
    c_in = x_cm.shape[0]
    pos = lax.broadcasted_iota(jnp.int32, (c_in, N), 1)
    col = jnp.bitwise_and(pos, W - 1)                       # j   (W, H*W are powers of 2)
    row = jnp.bitwise_and(pos >> LOG2_W, H - 1)             # i

    taps = []
    for dh in (-1, 0, 1):
        for dw in (-1, 0, 1):
            shifted = _shift_flat(x_cm, dh * W + dw)
            valid = ((row + dh >= 0) & (row + dh < H) &
                     (col + dw >= 0) & (col + dw < W))
            taps.append(jnp.where(valid, shifted, 0.0))
    patches = jnp.concatenate(taps, axis=0)                 # (9*c_in, N)
    return jnp.dot(w_t, patches, preferred_element_type=jnp.float32) + b_c


def encoder_kernel(x_ref, w1_ref, b1_ref, w2_ref, b2_ref, o_ref):
    """Whole batch in one invocation; all refs are full arrays resident in VMEM.

    x_ref : (CP, N)        channel-major input (channels zero-padded to CP)
    w1_ref: (C1, K*K*CP)   conv1 weights, tap-major
    b1_ref: (C1, 1)
    w2_ref: (C2, K*K*C1)   conv2 weights, tap-major
    b2_ref: (C2, 1)
    o_ref : (C2, N)        channel-major output (lane-dense, last dim 512)
    """
    x = x_ref[...]
    h1 = jnp.maximum(_conv3x3_same_cm(x, w1_ref[...], b1_ref[...]), 0.0)
    h2 = jnp.maximum(_conv3x3_same_cm(h1, w2_ref[...], b2_ref[...]), 0.0)
    o_ref[...] = h2.astype(o_ref.dtype)


@jax.jit
def encoder_forward(x_nchw, w1, b1, w2, b2):
    """Conv stack forward. x_nchw: (B, CIN, H, W) f32 -> (B, C2, H, W) f32."""
    # Wrapper-side layout plumbing only: NCHW -> channel-major (C, B*H*W), pad channels.
    x_cm = jnp.transpose(x_nchw, (1, 0, 2, 3)).reshape(CIN, N)
    x_cm = jnp.pad(x_cm, ((0, CP - CIN), (0, 0)))                     # (CP, N)

    w1_t = jnp.pad(w1, ((0, 0), (0, 0), (0, CP - CIN), (0, 0))
                   ).reshape(K * K * CP, C1).T                        # (C1, 72)
    w2_t = w2.reshape(K * K * C1, C2).T                               # (C2, 72)
    b1_c = b1.reshape(C1, 1)
    b2_c = b2.reshape(C2, 1)

    out_cm = pl.pallas_call(
        encoder_kernel,
        out_shape=jax.ShapeDtypeStruct((C2, N), jnp.float32),
        in_specs=[pl.BlockSpec(memory_space=pltpu.MemorySpace.VMEM)] * 5,
        out_specs=pl.BlockSpec(memory_space=pltpu.MemorySpace.VMEM),
    )(x_cm, w1_t, b1_c, w2_t, b2_c)

    # (C2, B*H*W) -> (B, C2, H, W): pure reshape/transpose outside the kernel.
    return jnp.transpose(out_cm.reshape(C2, B, H, W), (1, 0, 2, 3))


def encoder_ref(x_nchw, w1, b1, w2, b2):
    """Pure-JAX reference (same conv stack) for correctness checking."""
    x = jnp.transpose(x_nchw, (0, 2, 3, 1))
    y = jax.lax.conv_general_dilated(
        x, w1, window_strides=(1, 1), padding="SAME",
        dimension_numbers=("NHWC", "HWIO", "NHWC"))
    y = jnp.maximum(y + b1, 0.0)
    y = jax.lax.conv_general_dilated(
        y, w2, window_strides=(1, 1), padding="SAME",
        dimension_numbers=("NHWC", "HWIO", "NHWC"))
    y = jnp.maximum(y + b2, 0.0)
    return jnp.transpose(y, (0, 3, 1, 2))


if __name__ == "__main__":
    key = jax.random.PRNGKey(0)
    kx, k1, k2, k3, k4 = jax.random.split(key, 5)

    # Deterministic inputs / parameters.
    x = jax.random.normal(kx, (B, CIN, H, W), dtype=jnp.float32)
    w1 = jax.random.normal(k1, (K, K, CIN, C1), dtype=jnp.float32) * 0.1
    b1 = jax.random.normal(k2, (C1,), dtype=jnp.float32) * 0.1
    w2 = jax.random.normal(k3, (K, K, C1, C2), dtype=jnp.float32) * 0.1
    b2 = jax.random.normal(k4, (C2,), dtype=jnp.float32) * 0.1

    out = jax.block_until_ready(encoder_forward(x, w1, b1, w2, b2))
    ref = jax.block_until_ready(encoder_ref(x, w1, b1, w2, b2))

    assert out.shape == (B, C2, H, W)
    assert jnp.allclose(out, ref, rtol=1e-4, atol=1e-4)

    # compute_output_shape semantics: flattened per-example feature size.
    n_size = out.reshape(B, -1).shape[1]
    assert n_size == C2 * H * W

    print("KERNEL_OK")
</pallas_src>

<mosaic_0001>
module attributes {stable_mosaic.version = 11 : i64} {
  func.func @encoder_kernel(%arg0: memref<8x512xf32, #tpu.memory_space<vmem>>, %arg1: memref<8x72xf32, #tpu.memory_space<vmem>>, %arg2: memref<8x1xf32, #tpu.memory_space<vmem>>, %arg3: memref<8x72xf32, #tpu.memory_space<vmem>>, %arg4: memref<8x1xf32, #tpu.memory_space<vmem>>, %arg5: memref<8x512xf32, #tpu.memory_space<vmem>>) attributes {dimension_semantics = [], scalar_prefetch = 0 : i64, scratch_operands = 0 : i64, tpu.core_type = #tpu.core_type<tc>} {
    %c0 = arith.constant 0 : index
    %c0_0 = arith.constant 0 : index
    %0 = vector.load %arg0[%c0, %c0_0] : memref<8x512xf32, #tpu.memory_space<vmem>>, vector<8x512xf32>
    %c0_1 = arith.constant 0 : index
    %c0_2 = arith.constant 0 : index
    %1 = vector.load %arg1[%c0_1, %c0_2] : memref<8x72xf32, #tpu.memory_space<vmem>>, vector<8x72xf32>
    %c0_3 = arith.constant 0 : index
    %c0_4 = arith.constant 0 : index
    %2 = vector.load %arg2[%c0_3, %c0_4] : memref<8x1xf32, #tpu.memory_space<vmem>>, vector<8x1xf32>
    %3 = tpu.iota {dimensions = array<i32: 1>} : vector<8x512xi32>
    %c15_i32 = arith.constant 15 : i32
    %4 = vector.broadcast %c15_i32 : i32 to vector<8x512xi32>
    %5 = arith.andi %3, %4 : vector<8x512xi32>
    %c4_i32 = arith.constant 4 : i32
    %6 = vector.broadcast %c4_i32 : i32 to vector<8x512xi32>
    %7 = arith.shrsi %3, %6 : vector<8x512xi32>
    %c15_i32_5 = arith.constant 15 : i32
    %8 = vector.broadcast %c15_i32_5 : i32 to vector<8x512xi32>
    %9 = arith.andi %7, %8 : vector<8x512xi32>
    %cst = arith.constant 0.000000e+00 : f32
    %10 = vector.broadcast %cst : f32 to vector<8x17xf32>
    %11 = vector.extract_strided_slice %0 {offsets = [0, 0], sizes = [8, 495], strides = [1, 1]} : vector<8x512xf32> to vector<8x495xf32>
    %12 = tpu.concatenate %10, %11 in 1 : vector<8x17xf32>, vector<8x495xf32> -> vector<8x512xf32>
    %c-1_i32 = arith.constant -1 : i32
    %13 = vector.broadcast %c-1_i32 : i32 to vector<8x512xi32>
    %14 = arith.addi %9, %13 : vector<8x512xi32>
    %c0_i32 = arith.constant 0 : i32
    %15 = vector.broadcast %c0_i32 : i32 to vector<8x512xi32>
    %16 = arith.cmpi sge, %14, %15 : vector<8x512xi32>
    %c-1_i32_6 = arith.constant -1 : i32
    %17 = vector.broadcast %c-1_i32_6 : i32 to vector<8x512xi32>
    %18 = arith.addi %9, %17 : vector<8x512xi32>
    %c16_i32 = arith.constant 16 : i32
    %19 = vector.broadcast %c16_i32 : i32 to vector<8x512xi32>
    %20 = arith.cmpi slt, %18, %19 : vector<8x512xi32>
    %21 = arith.andi %16, %20 : vector<8x512xi1>
    %c-1_i32_7 = arith.constant -1 : i32
    %22 = vector.broadcast %c-1_i32_7 : i32 to vector<8x512xi32>
    %23 = arith.addi %5, %22 : vector<8x512xi32>
    %c0_i32_8 = arith.constant 0 : i32
    %24 = vector.broadcast %c0_i32_8 : i32 to vector<8x512xi32>
    %25 = arith.cmpi sge, %23, %24 : vector<8x512xi32>
    %26 = arith.andi %21, %25 : vector<8x512xi1>
    %c-1_i32_9 = arith.constant -1 : i32
    %27 = vector.broadcast %c-1_i32_9 : i32 to vector<8x512xi32>
    %28 = arith.addi %5, %27 : vector<8x512xi32>
    %c16_i32_10 = arith.constant 16 : i32
    %29 = vector.broadcast %c16_i32_10 : i32 to vector<8x512xi32>
    %30 = arith.cmpi slt, %28, %29 : vector<8x512xi32>
    %31 = arith.andi %26, %30 : vector<8x512xi1>
    %cst_11 = arith.constant 0.000000e+00 : f32
    %32 = vector.broadcast %cst_11 : f32 to vector<8x512xf32>
    %33 = arith.select %31, %12, %32 : vector<8x512xi1>, vector<8x512xf32>
    %cst_12 = arith.constant 0.000000e+00 : f32
    %34 = vector.broadcast %cst_12 : f32 to vector<8x16xf32>
    %35 = vector.extract_strided_slice %0 {offsets = [0, 0], sizes = [8, 496], strides = [1, 1]} : vector<8x512xf32> to vector<8x496xf32>
    %36 = tpu.concatenate %34, %35 in 1 : vector<8x16xf32>, vector<8x496xf32> -> vector<8x512xf32>
    %c-1_i32_13 = arith.constant -1 : i32
    %37 = vector.broadcast %c-1_i32_13 : i32 to vector<8x512xi32>
    %38 = arith.addi %9, %37 : vector<8x512xi32>
    %c0_i32_14 = arith.constant 0 : i32
    %39 = vector.broadcast %c0_i32_14 : i32 to vector<8x512xi32>
    %40 = arith.cmpi sge, %38, %39 : vector<8x512xi32>
    %c-1_i32_15 = arith.constant -1 : i32
    %41 = vector.broadcast %c-1_i32_15 : i32 to vector<8x512xi32>
    %42 = arith.addi %9, %41 : vector<8x512xi32>
    %c16_i32_16 = arith.constant 16 : i32
    %43 = vector.broadcast %c16_i32_16 : i32 to vector<8x512xi32>
    %44 = arith.cmpi slt, %42, %43 : vector<8x512xi32>
    %45 = arith.andi %40, %44 : vector<8x512xi1>
    %c0_i32_17 = arith.constant 0 : i32
    %46 = vector.broadcast %c0_i32_17 : i32 to vector<8x512xi32>
    %47 = arith.addi %5, %46 : vector<8x512xi32>
    %c0_i32_18 = arith.constant 0 : i32
    %48 = vector.broadcast %c0_i32_18 : i32 to vector<8x512xi32>
    %49 = arith.cmpi sge, %47, %48 : vector<8x512xi32>
    %50 = arith.andi %45, %49 : vector<8x512xi1>
    %c0_i32_19 = arith.constant 0 : i32
    %51 = vector.broadcast %c0_i32_19 : i32 to vector<8x512xi32>
    %52 = arith.addi %5, %51 : vector<8x512xi32>
    %c16_i32_20 = arith.constant 16 : i32
    %53 = vector.broadcast %c16_i32_20 : i32 to vector<8x512xi32>
    %54 = arith.cmpi slt, %52, %53 : vector<8x512xi32>
    %55 = arith.andi %50, %54 : vector<8x512xi1>
    %cst_21 = arith.constant 0.000000e+00 : f32
    %56 = vector.broadcast %cst_21 : f32 to vector<8x512xf32>
    %57 = arith.select %55, %36, %56 : vector<8x512xi1>, vector<8x512xf32>
    %cst_22 = arith.constant 0.000000e+00 : f32
    %58 = vector.broadcast %cst_22 : f32 to vector<8x15xf32>
    %59 = vector.extract_strided_slice %0 {offsets = [0, 0], sizes = [8, 497], strides = [1, 1]} : vector<8x512xf32> to vector<8x497xf32>
    %60 = tpu.concatenate %58, %59 in 1 : vector<8x15xf32>, vector<8x497xf32> -> vector<8x512xf32>
    %c-1_i32_23 = arith.constant -1 : i32
    %61 = vector.broadcast %c-1_i32_23 : i32 to vector<8x512xi32>
    %62 = arith.addi %9, %61 : vector<8x512xi32>
    %c0_i32_24 = arith.constant 0 : i32
    %63 = vector.broadcast %c0_i32_24 : i32 to vector<8x512xi32>
    %64 = arith.cmpi sge, %62, %63 : vector<8x512xi32>
    %c-1_i32_25 = arith.constant -1 : i32
    %65 = vector.broadcast %c-1_i32_25 : i32 to vector<8x512xi32>
    %66 = arith.addi %9, %65 : vector<8x512xi32>
    %c16_i32_26 = arith.constant 16 : i32
    %67 = vector.broadcast %c16_i32_26 : i32 to vector<8x512xi32>
    %68 = arith.cmpi slt, %66, %67 : vector<8x512xi32>
    %69 = arith.andi %64, %68 : vector<8x512xi1>
    %c1_i32 = arith.constant 1 : i32
    %70 = vector.broadcast %c1_i32 : i32 to vector<8x512xi32>
    %71 = arith.addi %5, %70 : vector<8x512xi32>
    %c0_i32_27 = arith.constant 0 : i32
    %72 = vector.broadcast %c0_i32_27 : i32 to vector<8x512xi32>
    %73 = arith.cmpi sge, %71, %72 : vector<8x512xi32>
    %74 = arith.andi %69, %73 : vector<8x512xi1>
    %c1_i32_28 = arith.constant 1 : i32
    %75 = vector.broadcast %c1_i32_28 : i32 to vector<8x512xi32>
    %76 = arith.addi %5, %75 : vector<8x512xi32>
    %c16_i32_29 = arith.constant 16 : i32
    %77 = vector.broadcast %c16_i32_29 : i32 to vector<8x512xi32>
    %78 = arith.cmpi slt, %76, %77 : vector<8x512xi32>
    %79 = arith.andi %74, %78 : vector<8x512xi1>
    %cst_30 = arith.constant 0.000000e+00 : f32
    %80 = vector.broadcast %cst_30 : f32 to vector<8x512xf32>
    %81 = arith.select %79, %60, %80 : vector<8x512xi1>, vector<8x512xf32>
    %cst_31 = arith.constant 0.000000e+00 : f32
    %82 = vector.broadcast %cst_31 : f32 to vector<8x1xf32>
    %83 = vector.extract_strided_slice %0 {offsets = [0, 0], sizes = [8, 511], strides = [1, 1]} : vector<8x512xf32> to vector<8x511xf32>
    %84 = tpu.concatenate %82, %83 in 1 : vector<8x1xf32>, vector<8x511xf32> -> vector<8x512xf32>
    %c0_i32_32 = arith.constant 0 : i32
    %85 = vector.broadcast %c0_i32_32 : i32 to vector<8x512xi32>
    %86 = arith.addi %9, %85 : vector<8x512xi32>
    %c0_i32_33 = arith.constant 0 : i32
    %87 = vector.broadcast %c0_i32_33 : i32 to vector<8x512xi32>
    %88 = arith.cmpi sge, %86, %87 : vector<8x512xi32>
    %c0_i32_34 = arith.constant 0 : i32
    %89 = vector.broadcast %c0_i32_34 : i32 to vector<8x512xi32>
    %90 = arith.addi %9, %89 : vector<8x512xi32>
    %c16_i32_35 = arith.constant 16 : i32
    %91 = vector.broadcast %c16_i32_35 : i32 to vector<8x512xi32>
    %92 = arith.cmpi slt, %90, %91 : vector<8x512xi32>
    %93 = arith.andi %88, %92 : vector<8x512xi1>
    %c-1_i32_36 = arith.constant -1 : i32
    %94 = vector.broadcast %c-1_i32_36 : i32 to vector<8x512xi32>
    %95 = arith.addi %5, %94 : vector<8x512xi32>
    %c0_i32_37 = arith.constant 0 : i32
    %96 = vector.broadcast %c0_i32_37 : i32 to vector<8x512xi32>
    %97 = arith.cmpi sge, %95, %96 : vector<8x512xi32>
    %98 = arith.andi %93, %97 : vector<8x512xi1>
    %c-1_i32_38 = arith.constant -1 : i32
    %99 = vector.broadcast %c-1_i32_38 : i32 to vector<8x512xi32>
    %100 = arith.addi %5, %99 : vector<8x512xi32>
    %c16_i32_39 = arith.constant 16 : i32
    %101 = vector.broadcast %c16_i32_39 : i32 to vector<8x512xi32>
    %102 = arith.cmpi slt, %100, %101 : vector<8x512xi32>
    %103 = arith.andi %98, %102 : vector<8x512xi1>
    %cst_40 = arith.constant 0.000000e+00 : f32
    %104 = vector.broadcast %cst_40 : f32 to vector<8x512xf32>
    %105 = arith.select %103, %84, %104 : vector<8x512xi1>, vector<8x512xf32>
    %c0_i32_41 = arith.constant 0 : i32
    %106 = vector.broadcast %c0_i32_41 : i32 to vector<8x512xi32>
    %107 = arith.addi %9, %106 : vector<8x512xi32>
    %c0_i32_42 = arith.constant 0 : i32
    %108 = vector.broadcast %c0_i32_42 : i32 to vector<8x512xi32>
    %109 = arith.cmpi sge, %107, %108 : vector<8x512xi32>
    %c0_i32_43 = arith.constant 0 : i32
    %110 = vector.broadcast %c0_i32_43 : i32 to vector<8x512xi32>
    %111 = arith.addi %9, %110 : vector<8x512xi32>
    %c16_i32_44 = arith.constant 16 : i32
    %112 = vector.broadcast %c16_i32_44 : i32 to vector<8x512xi32>
    %113 = arith.cmpi slt, %111, %112 : vector<8x512xi32>
    %114 = arith.andi %109, %113 : vector<8x512xi1>
    %c0_i32_45 = arith.constant 0 : i32
    %115 = vector.broadcast %c0_i32_45 : i32 to vector<8x512xi32>
    %116 = arith.addi %5, %115 : vector<8x512xi32>
    %c0_i32_46 = arith.constant 0 : i32
    %117 = vector.broadcast %c0_i32_46 : i32 to vector<8x512xi32>
    %118 = arith.cmpi sge, %116, %117 : vector<8x512xi32>
    %119 = arith.andi %114, %118 : vector<8x512xi1>
    %c0_i32_47 = arith.constant 0 : i32
    %120 = vector.broadcast %c0_i32_47 : i32 to vector<8x512xi32>
    %121 = arith.addi %5, %120 : vector<8x512xi32>
    %c16_i32_48 = arith.constant 16 : i32
    %122 = vector.broadcast %c16_i32_48 : i32 to vector<8x512xi32>
    %123 = arith.cmpi slt, %121, %122 : vector<8x512xi32>
    %124 = arith.andi %119, %123 : vector<8x512xi1>
    %cst_49 = arith.constant 0.000000e+00 : f32
    %125 = vector.broadcast %cst_49 : f32 to vector<8x512xf32>
    %126 = arith.select %124, %0, %125 : vector<8x512xi1>, vector<8x512xf32>
    %127 = vector.extract_strided_slice %0 {offsets = [0, 1], sizes = [8, 511], strides = [1, 1]} : vector<8x512xf32> to vector<8x511xf32>
    %cst_50 = arith.constant 0.000000e+00 : f32
    %128 = vector.broadcast %cst_50 : f32 to vector<8x1xf32>
    %129 = tpu.concatenate %127, %128 in 1 : vector<8x511xf32>, vector<8x1xf32> -> vector<8x512xf32>
    %c0_i32_51 = arith.constant 0 : i32
    %130 = vector.broadcast %c0_i32_51 : i32 to vector<8x512xi32>
    %131 = arith.addi %9, %130 : vector<8x512xi32>
    %c0_i32_52 = arith.constant 0 : i32
    %132 = vector.broadcast %c0_i32_52 : i32 to vector<8x512xi32>
    %133 = arith.cmpi sge, %131, %132 : vector<8x512xi32>
    %c0_i32_53 = arith.constant 0 : i32
    %134 = vector.broadcast %c0_i32_53 : i32 to vector<8x512xi32>
    %135 = arith.addi %9, %134 : vector<8x512xi32>
    %c16_i32_54 = arith.constant 16 : i32
    %136 = vector.broadcast %c16_i32_54 : i32 to vector<8x512xi32>
    %137 = arith.cmpi slt, %135, %136 : vector<8x512xi32>
    %138 = arith.andi %133, %137 : vector<8x512xi1>
    %c1_i32_55 = arith.constant 1 : i32
    %139 = vector.broadcast %c1_i32_55 : i32 to vector<8x512xi32>
    %140 = arith.addi %5, %139 : vector<8x512xi32>
    %c0_i32_56 = arith.constant 0 : i32
    %141 = vector.broadcast %c0_i32_56 : i32 to vector<8x512xi32>
    %142 = arith.cmpi sge, %140, %141 : vector<8x512xi32>
    %143 = arith.andi %138, %142 : vector<8x512xi1>
    %c1_i32_57 = arith.constant 1 : i32
    %144 = vector.broadcast %c1_i32_57 : i32 to vector<8x512xi32>
    %145 = arith.addi %5, %144 : vector<8x512xi32>
    %c16_i32_58 = arith.constant 16 : i32
    %146 = vector.broadcast %c16_i32_58 : i32 to vector<8x512xi32>
    %147 = arith.cmpi slt, %145, %146 : vector<8x512xi32>
    %148 = arith.andi %143, %147 : vector<8x512xi1>
    %cst_59 = arith.constant 0.000000e+00 : f32
    %149 = vector.broadcast %cst_59 : f32 to vector<8x512xf32>
    %150 = arith.select %148, %129, %149 : vector<8x512xi1>, vector<8x512xf32>
    %151 = vector.extract_strided_slice %0 {offsets = [0, 15], sizes = [8, 497], strides = [1, 1]} : vector<8x512xf32> to vector<8x497xf32>
    %cst_60 = arith.constant 0.000000e+00 : f32
    %152 = vector.broadcast %cst_60 : f32 to vector<8x15xf32>
    %153 = tpu.concatenate %151, %152 in 1 : vector<8x497xf32>, vector<8x15xf32> -> vector<8x512xf32>
    %c1_i32_61 = arith.constant 1 : i32
    %154 = vector.broadcast %c1_i32_61 : i32 to vector<8x512xi32>
    %155 = arith.addi %9, %154 : vector<8x512xi32>
    %c0_i32_62 = arith.constant 0 : i32
    %156 = vector.broadcast %c0_i32_62 : i32 to vector<8x512xi32>
    %157 = arith.cmpi sge, %155, %156 : vector<8x512xi32>
    %c1_i32_63 = arith.constant 1 : i32
    %158 = vector.broadcast %c1_i32_63 : i32 to vector<8x512xi32>
    %159 = arith.addi %9, %158 : vector<8x512xi32>
    %c16_i32_64 = arith.constant 16 : i32
    %160 = vector.broadcast %c16_i32_64 : i32 to vector<8x512xi32>
    %161 = arith.cmpi slt, %159, %160 : vector<8x512xi32>
    %162 = arith.andi %157, %161 : vector<8x512xi1>
    %c-1_i32_65 = arith.constant -1 : i32
    %163 = vector.broadcast %c-1_i32_65 : i32 to vector<8x512xi32>
    %164 = arith.addi %5, %163 : vector<8x512xi32>
    %c0_i32_66 = arith.constant 0 : i32
    %165 = vector.broadcast %c0_i32_66 : i32 to vector<8x512xi32>
    %166 = arith.cmpi sge, %164, %165 : vector<8x512xi32>
    %167 = arith.andi %162, %166 : vector<8x512xi1>
    %c-1_i32_67 = arith.constant -1 : i32
    %168 = vector.broadcast %c-1_i32_67 : i32 to vector<8x512xi32>
    %169 = arith.addi %5, %168 : vector<8x512xi32>
    %c16_i32_68 = arith.constant 16 : i32
    %170 = vector.broadcast %c16_i32_68 : i32 to vector<8x512xi32>
    %171 = arith.cmpi slt, %169, %170 : vector<8x512xi32>
    %172 = arith.andi %167, %171 : vector<8x512xi1>
    %cst_69 = arith.constant 0.000000e+00 : f32
    %173 = vector.broadcast %cst_69 : f32 to vector<8x512xf32>
    %174 = arith.select %172, %153, %173 : vector<8x512xi1>, vector<8x512xf32>
    %175 = vector.extract_strided_slice %0 {offsets = [0, 16], sizes = [8, 496], strides = [1, 1]} : vector<8x512xf32> to vector<8x496xf32>
    %cst_70 = arith.constant 0.000000e+00 : f32
    %176 = vector.broadcast %cst_70 : f32 to vector<8x16xf32>
    %177 = tpu.concatenate %175, %176 in 1 : vector<8x496xf32>, vector<8x16xf32> -> vector<8x512xf32>
    %c1_i32_71 = arith.constant 1 : i32
    %178 = vector.broadcast %c1_i32_71 : i32 to vector<8x512xi32>
    %179 = arith.addi %9, %178 : vector<8x512xi32>
    %c0_i32_72 = arith.constant 0 : i32
    %180 = vector.broadcast %c0_i32_72 : i32 to vector<8x512xi32>
    %181 = arith.cmpi sge, %179, %180 : vector<8x512xi32>
    %c1_i32_73 = arith.constant 1 : i32
    %182 = vector.broadcast %c1_i32_73 : i32 to vector<8x512xi32>
    %183 = arith.addi %9, %182 : vector<8x512xi32>
    %c16_i32_74 = arith.constant 16 : i32
    %184 = vector.broadcast %c16_i32_74 : i32 to vector<8x512xi32>
    %185 = arith.cmpi slt, %183, %184 : vector<8x512xi32>
    %186 = arith.andi %181, %185 : vector<8x512xi1>
    %c0_i32_75 = arith.constant 0 : i32
    %187 = vector.broadcast %c0_i32_75 : i32 to vector<8x512xi32>
    %188 = arith.addi %5, %187 : vector<8x512xi32>
    %c0_i32_76 = arith.constant 0 : i32
    %189 = vector.broadcast %c0_i32_76 : i32 to vector<8x512xi32>
    %190 = arith.cmpi sge, %188, %189 : vector<8x512xi32>
    %191 = arith.andi %186, %190 : vector<8x512xi1>
    %c0_i32_77 = arith.constant 0 : i32
    %192 = vector.broadcast %c0_i32_77 : i32 to vector<8x512xi32>
    %193 = arith.addi %5, %192 : vector<8x512xi32>
    %c16_i32_78 = arith.constant 16 : i32
    %194 = vector.broadcast %c16_i32_78 : i32 to vector<8x512xi32>
    %195 = arith.cmpi slt, %193, %194 : vector<8x512xi32>
    %196 = arith.andi %191, %195 : vector<8x512xi1>
    %cst_79 = arith.constant 0.000000e+00 : f32
    %197 = vector.broadcast %cst_79 : f32 to vector<8x512xf32>
    %198 = arith.select %196, %177, %197 : vector<8x512xi1>, vector<8x512xf32>
    %199 = vector.extract_strided_slice %0 {offsets = [0, 17], sizes = [8, 495], strides = [1, 1]} : vector<8x512xf32> to vector<8x495xf32>
    %cst_80 = arith.constant 0.000000e+00 : f32
    %200 = vector.broadcast %cst_80 : f32 to vector<8x17xf32>
    %201 = tpu.concatenate %199, %200 in 1 : vector<8x495xf32>, vector<8x17xf32> -> vector<8x512xf32>
    %c1_i32_81 = arith.constant 1 : i32
    %202 = vector.broadcast %c1_i32_81 : i32 to vector<8x512xi32>
    %203 = arith.addi %9, %202 : vector<8x512xi32>
    %c0_i32_82 = arith.constant 0 : i32
    %204 = vector.broadcast %c0_i32_82 : i32 to vector<8x512xi32>
    %205 = arith.cmpi sge, %203, %204 : vector<8x512xi32>
    %c1_i32_83 = arith.constant 1 : i32
    %206 = vector.broadcast %c1_i32_83 : i32 to vector<8x512xi32>
    %207 = arith.addi %9, %206 : vector<8x512xi32>
    %c16_i32_84 = arith.constant 16 : i32
    %208 = vector.broadcast %c16_i32_84 : i32 to vector<8x512xi32>
    %209 = arith.cmpi slt, %207, %208 : vector<8x512xi32>
    %210 = arith.andi %205, %209 : vector<8x512xi1>
    %c1_i32_85 = arith.constant 1 : i32
    %211 = vector.broadcast %c1_i32_85 : i32 to vector<8x512xi32>
    %212 = arith.addi %5, %211 : vector<8x512xi32>
    %c0_i32_86 = arith.constant 0 : i32
    %213 = vector.broadcast %c0_i32_86 : i32 to vector<8x512xi32>
    %214 = arith.cmpi sge, %212, %213 : vector<8x512xi32>
    %215 = arith.andi %210, %214 : vector<8x512xi1>
    %c1_i32_87 = arith.constant 1 : i32
    %216 = vector.broadcast %c1_i32_87 : i32 to vector<8x512xi32>
    %217 = arith.addi %5, %216 : vector<8x512xi32>
    %c16_i32_88 = arith.constant 16 : i32
    %218 = vector.broadcast %c16_i32_88 : i32 to vector<8x512xi32>
    %219 = arith.cmpi slt, %217, %218 : vector<8x512xi32>
    %220 = arith.andi %215, %219 : vector<8x512xi1>
    %cst_89 = arith.constant 0.000000e+00 : f32
    %221 = vector.broadcast %cst_89 : f32 to vector<8x512xf32>
    %222 = arith.select %220, %201, %221 : vector<8x512xi1>, vector<8x512xf32>
    %223 = tpu.concatenate %33, %57, %81, %105, %126, %150, %174, %198, %222 in 0 : vector<8x512xf32>, vector<8x512xf32>, vector<8x512xf32>, vector<8x512xf32>, vector<8x512xf32>, vector<8x512xf32>, vector<8x512xf32>, vector<8x512xf32>, vector<8x512xf32> -> vector<72x512xf32>
    %cst_90 = arith.constant dense<0.000000e+00> : vector<8x512xf32>
    %224 = tpu.matmul %1, %223, %cst_90 {dimension_numbers = #tpu.dot_dimension_numbers<[1], [0], [0], [1], [0, 0, 1, 1], [], []>} : vector<8x72xf32>, vector<72x512xf32>, vector<8x512xf32> -> vector<8x512xf32>
    %225 = vector.broadcast %2 : vector<8x1xf32> to vector<8x512xf32>
    %226 = arith.addf %224, %225 : vector<8x512xf32>
    %cst_91 = arith.constant 0.000000e+00 : f32
    %227 = vector.broadcast %cst_91 : f32 to vector<8x512xf32>
    %228 = arith.maximumf %226, %227 : vector<8x512xf32>
    %c0_92 = arith.constant 0 : index
    %c0_93 = arith.constant 0 : index
    %229 = vector.load %arg3[%c0_92, %c0_93] : memref<8x72xf32, #tpu.memory_space<vmem>>, vector<8x72xf32>
    %c0_94 = arith.constant 0 : index
    %c0_95 = arith.constant 0 : index
    %230 = vector.load %arg4[%c0_94, %c0_95] : memref<8x1xf32, #tpu.memory_space<vmem>>, vector<8x1xf32>
    %231 = tpu.iota {dimensions = array<i32: 1>} : vector<8x512xi32>
    %c15_i32_96 = arith.constant 15 : i32
    %232 = vector.broadcast %c15_i32_96 : i32 to vector<8x512xi32>
    %233 = arith.andi %231, %232 : vector<8x512xi32>
    %c4_i32_97 = arith.constant 4 : i32
    %234 = vector.broadcast %c4_i32_97 : i32 to vector<8x512xi32>
    %235 = arith.shrsi %231, %234 : vector<8x512xi32>
    %c15_i32_98 = arith.constant 15 : i32
    %236 = vector.broadcast %c15_i32_98 : i32 to vector<8x512xi32>
    %237 = arith.andi %235, %236 : vector<8x512xi32>
    %cst_99 = arith.constant 0.000000e+00 : f32
    %238 = vector.broadcast %cst_99 : f32 to vector<8x17xf32>
    %239 = vector.extract_strided_slice %228 {offsets = [0, 0], sizes = [8, 495], strides = [1, 1]} : vector<8x512xf32> to vector<8x495xf32>
    %240 = tpu.concatenate %238, %239 in 1 : vector<8x17xf32>, vector<8x495xf32> -> vector<8x512xf32>
    %c-1_i32_100 = arith.constant -1 : i32
    %241 = vector.broadcast %c-1_i32_100 : i32 to vector<8x512xi32>
    %242 = arith.addi %237, %241 : vector<8x512xi32>
    %c0_i32_101 = arith.constant 0 : i32
    %243 = vector.broadcast %c0_i32_101 : i32 to vector<8x512xi32>
    %244 = arith.cmpi sge, %242, %243 : vector<8x512xi32>
    %c-1_i32_102 = arith.constant -1 : i32
    %245 = vector.broadcast %c-1_i32_102 : i32 to vector<8x512xi32>
    %246 = arith.addi %237, %245 : vector<8x512xi32>
    %c16_i32_103 = arith.constant 16 : i32
    %247 = vector.broadcast %c16_i32_103 : i32 to vector<8x512xi32>
    %248 = arith.cmpi slt, %246, %247 : vector<8x512xi32>
    %249 = arith.andi %244, %248 : vector<8x512xi1>
    %c-1_i32_104 = arith.constant -1 : i32
    %250 = vector.broadcast %c-1_i32_104 : i32 to vector<8x512xi32>
    %251 = arith.addi %233, %250 : vector<8x512xi32>
    %c0_i32_105 = arith.constant 0 : i32
    %252 = vector.broadcast %c0_i32_105 : i32 to vector<8x512xi32>
    %253 = arith.cmpi sge, %251, %252 : vector<8x512xi32>
    %254 = arith.andi %249, %253 : vector<8x512xi1>
    %c-1_i32_106 = arith.constant -1 : i32
    %255 = vector.broadcast %c-1_i32_106 : i32 to vector<8x512xi32>
    %256 = arith.addi %233, %255 : vector<8x512xi32>
    %c16_i32_107 = arith.constant 16 : i32
    %257 = vector.broadcast %c16_i32_107 : i32 to vector<8x512xi32>
    %258 = arith.cmpi slt, %256, %257 : vector<8x512xi32>
    %259 = arith.andi %254, %258 : vector<8x512xi1>
    %cst_108 = arith.constant 0.000000e+00 : f32
    %260 = vector.broadcast %cst_108 : f32 to vector<8x512xf32>
    %261 = arith.select %259, %240, %260 : vector<8x512xi1>, vector<8x512xf32>
    %cst_109 = arith.constant 0.000000e+00 : f32
    %262 = vector.broadcast %cst_109 : f32 to vector<8x16xf32>
    %263 = vector.extract_strided_slice %228 {offsets = [0, 0], sizes = [8, 496], strides = [1, 1]} : vector<8x512xf32> to vector<8x496xf32>
    %264 = tpu.concatenate %262, %263 in 1 : vector<8x16xf32>, vector<8x496xf32> -> vector<8x512xf32>
    %c-1_i32_110 = arith.constant -1 : i32
    %265 = vector.broadcast %c-1_i32_110 : i32 to vector<8x512xi32>
    %266 = arith.addi %237, %265 : vector<8x512xi32>
    %c0_i32_111 = arith.constant 0 : i32
    %267 = vector.broadcast %c0_i32_111 : i32 to vector<8x512xi32>
    %268 = arith.cmpi sge, %266, %267 : vector<8x512xi32>
    %c-1_i32_112 = arith.constant -1 : i32
    %269 = vector.broadcast %c-1_i32_112 : i32 to vector<8x512xi32>
    %270 = arith.addi %237, %269 : vector<8x512xi32>
    %c16_i32_113 = arith.constant 16 : i32
    %271 = vector.broadcast %c16_i32_113 : i32 to vector<8x512xi32>
    %272 = arith.cmpi slt, %270, %271 : vector<8x512xi32>
    %273 = arith.andi %268, %272 : vector<8x512xi1>
    %c0_i32_114 = arith.constant 0 : i32
    %274 = vector.broadcast %c0_i32_114 : i32 to vector<8x512xi32>
    %275 = arith.addi %233, %274 : vector<8x512xi32>
    %c0_i32_115 = arith.constant 0 : i32
    %276 = vector.broadcast %c0_i32_115 : i32 to vector<8x512xi32>
    %277 = arith.cmpi sge, %275, %276 : vector<8x512xi32>
    %278 = arith.andi %273, %277 : vector<8x512xi1>
    %c0_i32_116 = arith.constant 0 : i32
    %279 = vector.broadcast %c0_i32_116 : i32 to vector<8x512xi32>
    %280 = arith.addi %233, %279 : vector<8x512xi32>
    %c16_i32_117 = arith.constant 16 : i32
    %281 = vector.broadcast %c16_i32_117 : i32 to vector<8x512xi32>
    %282 = arith.cmpi slt, %280, %281 : vector<8x512xi32>
    %283 = arith.andi %278, %282 : vector<8x512xi1>
    %cst_118 = arith.constant 0.000000e+00 : f32
    %284 = vector.broadcast %cst_118 : f32 to vector<8x512xf32>
    %285 = arith.select %283, %264, %284 : vector<8x512xi1>, vector<8x512xf32>
    %cst_119 = arith.constant 0.000000e+00 : f32
    %286 = vector.broadcast %cst_119 : f32 to vector<8x15xf32>
    %287 = vector.extract_strided_slice %228 {offsets = [0, 0], sizes = [8, 497], strides = [1, 1]} : vector<8x512xf32> to vector<8x497xf32>
    %288 = tpu.concatenate %286, %287 in 1 : vector<8x15xf32>, vector<8x497xf32> -> vector<8x512xf32>
    %c-1_i32_120 = arith.constant -1 : i32
    %289 = vector.broadcast %c-1_i32_120 : i32 to vector<8x512xi32>
    %290 = arith.addi %237, %289 : vector<8x512xi32>
    %c0_i32_121 = arith.constant 0 : i32
    %291 = vector.broadcast %c0_i32_121 : i32 to vector<8x512xi32>
    %292 = arith.cmpi sge, %290, %291 : vector<8x512xi32>
    %c-1_i32_122 = arith.constant -1 : i32
    %293 = vector.broadcast %c-1_i32_122 : i32 to vector<8x512xi32>
    %294 = arith.addi %237, %293 : vector<8x512xi32>
    %c16_i32_123 = arith.constant 16 : i32
    %295 = vector.broadcast %c16_i32_123 : i32 to vector<8x512xi32>
    %296 = arith.cmpi slt, %294, %295 : vector<8x512xi32>
    %297 = arith.andi %292, %296 : vector<8x512xi1>
    %c1_i32_124 = arith.constant 1 : i32
    %298 = vector.broadcast %c1_i32_124 : i32 to vector<8x512xi32>
    %299 = arith.addi %233, %298 : vector<8x512xi32>
    %c0_i32_125 = arith.constant 0 : i32
    %300 = vector.broadcast %c0_i32_125 : i32 to vector<8x512xi32>
    %301 = arith.cmpi sge, %299, %300 : vector<8x512xi32>
    %302 = arith.andi %297, %301 : vector<8x512xi1>
    %c1_i32_126 = arith.constant 1 : i32
    %303 = vector.broadcast %c1_i32_126 : i32 to vector<8x512xi32>
    %304 = arith.addi %233, %303 : vector<8x512xi32>
    %c16_i32_127 = arith.constant 16 : i32
    %305 = vector.broadcast %c16_i32_127 : i32 to vector<8x512xi32>
    %306 = arith.cmpi slt, %304, %305 : vector<8x512xi32>
    %307 = arith.andi %302, %306 : vector<8x512xi1>
    %cst_128 = arith.constant 0.000000e+00 : f32
    %308 = vector.broadcast %cst_128 : f32 to vector<8x512xf32>
    %309 = arith.select %307, %288, %308 : vector<8x512xi1>, vector<8x512xf32>
    %cst_129 = arith.constant 0.000000e+00 : f32
    %310 = vector.broadcast %cst_129 : f32 to vector<8x1xf32>
    %311 = vector.extract_strided_slice %228 {offsets = [0, 0], sizes = [8, 511], strides = [1, 1]} : vector<8x512xf32> to vector<8x511xf32>
    %312 = tpu.concatenate %310, %311 in 1 : vector<8x1xf32>, vector<8x511xf32> -> vector<8x512xf32>
    %c0_i32_130 = arith.constant 0 : i32
    %313 = vector.broadcast %c0_i32_130 : i32 to vector<8x512xi32>
    %314 = arith.addi %237, %313 : vector<8x512xi32>
    %c0_i32_131 = arith.constant 0 : i32
    %315 = vector.broadcast %c0_i32_131 : i32 to vector<8x512xi32>
    %316 = arith.cmpi sge, %314, %315 : vector<8x512xi32>
    %c0_i32_132 = arith.constant 0 : i32
    %317 = vector.broadcast %c0_i32_132 : i32 to vector<8x512xi32>
    %318 = arith.addi %237, %317 : vector<8x512xi32>
    %c16_i32_133 = arith.constant 16 : i32
    %319 = vector.broadcast %c16_i32_133 : i32 to vector<8x512xi32>
    %320 = arith.cmpi slt, %318, %319 : vector<8x512xi32>
    %321 = arith.andi %316, %320 : vector<8x512xi1>
    %c-1_i32_134 = arith.constant -1 : i32
    %322 = vector.broadcast %c-1_i32_134 : i32 to vector<8x512xi32>
    %323 = arith.addi %233, %322 : vector<8x512xi32>
    %c0_i32_135 = arith.constant 0 : i32
    %324 = vector.broadcast %c0_i32_135 : i32 to vector<8x512xi32>
    %325 = arith.cmpi sge, %323, %324 : vector<8x512xi32>
    %326 = arith.andi %321, %325 : vector<8x512xi1>
    %c-1_i32_136 = arith.constant -1 : i32
    %327 = vector.broadcast %c-1_i32_136 : i32 to vector<8x512xi32>
    %328 = arith.addi %233, %327 : vector<8x512xi32>
    %c16_i32_137 = arith.constant 16 : i32
    %329 = vector.broadcast %c16_i32_137 : i32 to vector<8x512xi32>
    %330 = arith.cmpi slt, %328, %329 : vector<8x512xi32>
    %331 = arith.andi %326, %330 : vector<8x512xi1>
    %cst_138 = arith.constant 0.000000e+00 : f32
    %332 = vector.broadcast %cst_138 : f32 to vector<8x512xf32>
    %333 = arith.select %331, %312, %332 : vector<8x512xi1>, vector<8x512xf32>
    %c0_i32_139 = arith.constant 0 : i32
    %334 = vector.broadcast %c0_i32_139 : i32 to vector<8x512xi32>
    %335 = arith.addi %237, %334 : vector<8x512xi32>
    %c0_i32_140 = arith.constant 0 : i32
    %336 = vector.broadcast %c0_i32_140 : i32 to vector<8x512xi32>
    %337 = arith.cmpi sge, %335, %336 : vector<8x512xi32>
    %c0_i32_141 = arith.constant 0 : i32
    %338 = vector.broadcast %c0_i32_141 : i32 to vector<8x512xi32>
    %339 = arith.addi %237, %338 : vector<8x512xi32>
    %c16_i32_142 = arith.constant 16 : i32
    %340 = vector.broadcast %c16_i32_142 : i32 to vector<8x512xi32>
    %341 = arith.cmpi slt, %339, %340 : vector<8x512xi32>
    %342 = arith.andi %337, %341 : vector<8x512xi1>
    %c0_i32_143 = arith.constant 0 : i32
    %343 = vector.broadcast %c0_i32_143 : i32 to vector<8x512xi32>
    %344 = arith.addi %233, %343 : vector<8x512xi32>
    %c0_i32_144 = arith.constant 0 : i32
    %345 = vector.broadcast %c0_i32_144 : i32 to vector<8x512xi32>
    %346 = arith.cmpi sge, %344, %345 : vector<8x512xi32>
    %347 = arith.andi %342, %346 : vector<8x512xi1>
    %c0_i32_145 = arith.constant 0 : i32
    %348 = vector.broadcast %c0_i32_145 : i32 to vector<8x512xi32>
    %349 = arith.addi %233, %348 : vector<8x512xi32>
    %c16_i32_146 = arith.constant 16 : i32
    %350 = vector.broadcast %c16_i32_146 : i32 to vector<8x512xi32>
    %351 = arith.cmpi slt, %349, %350 : vector<8x512xi32>
    %352 = arith.andi %347, %351 : vector<8x512xi1>
    %cst_147 = arith.constant 0.000000e+00 : f32
    %353 = vector.broadcast %cst_147 : f32 to vector<8x512xf32>
    %354 = arith.select %352, %228, %353 : vector<8x512xi1>, vector<8x512xf32>
    %355 = vector.extract_strided_slice %228 {offsets = [0, 1], sizes = [8, 511], strides = [1, 1]} : vector<8x512xf32> to vector<8x511xf32>
    %cst_148 = arith.constant 0.000000e+00 : f32
    %356 = vector.broadcast %cst_148 : f32 to vector<8x1xf32>
    %357 = tpu.concatenate %355, %356 in 1 : vector<8x511xf32>, vector<8x1xf32> -> vector<8x512xf32>
    %c0_i32_149 = arith.constant 0 : i32
    %358 = vector.broadcast %c0_i32_149 : i32 to vector<8x512xi32>
    %359 = arith.addi %237, %358 : vector<8x512xi32>
    %c0_i32_150 = arith.constant 0 : i32
    %360 = vector.broadcast %c0_i32_150 : i32 to vector<8x512xi32>
    %361 = arith.cmpi sge, %359, %360 : vector<8x512xi32>
    %c0_i32_151 = arith.constant 0 : i32
    %362 = vector.broadcast %c0_i32_151 : i32 to vector<8x512xi32>
    %363 = arith.addi %237, %362 : vector<8x512xi32>
    %c16_i32_152 = arith.constant 16 : i32
    %364 = vector.broadcast %c16_i32_152 : i32 to vector<8x512xi32>
    %365 = arith.cmpi slt, %363, %364 : vector<8x512xi32>
    %366 = arith.andi %361, %365 : vector<8x512xi1>
    %c1_i32_153 = arith.constant 1 : i32
    %367 = vector.broadcast %c1_i32_153 : i32 to vector<8x512xi32>
    %368 = arith.addi %233, %367 : vector<8x512xi32>
    %c0_i32_154 = arith.constant 0 : i32
    %369 = vector.broadcast %c0_i32_154 : i32 to vector<8x512xi32>
    %370 = arith.cmpi sge, %368, %369 : vector<8x512xi32>
    %371 = arith.andi %366, %370 : vector<8x512xi1>
    %c1_i32_155 = arith.constant 1 : i32
    %372 = vector.broadcast %c1_i32_155 : i32 to vector<8x512xi32>
    %373 = arith.addi %233, %372 : vector<8x512xi32>
    %c16_i32_156 = arith.constant 16 : i32
    %374 = vector.broadcast %c16_i32_156 : i32 to vector<8x512xi32>
    %375 = arith.cmpi slt, %373, %374 : vector<8x512xi32>
    %376 = arith.andi %371, %375 : vector<8x512xi1>
    %cst_157 = arith.constant 0.000000e+00 : f32
    %377 = vector.broadcast %cst_157 : f32 to vector<8x512xf32>
    %378 = arith.select %376, %357, %377 : vector<8x512xi1>, vector<8x512xf32>
    %379 = vector.extract_strided_slice %228 {offsets = [0, 15], sizes = [8, 497], strides = [1, 1]} : vector<8x512xf32> to vector<8x497xf32>
    %cst_158 = arith.constant 0.000000e+00 : f32
    %380 = vector.broadcast %cst_158 : f32 to vector<8x15xf32>
    %381 = tpu.concatenate %379, %380 in 1 : vector<8x497xf32>, vector<8x15xf32> -> vector<8x512xf32>
    %c1_i32_159 = arith.constant 1 : i32
    %382 = vector.broadcast %c1_i32_159 : i32 to vector<8x512xi32>
    %383 = arith.addi %237, %382 : vector<8x512xi32>
    %c0_i32_160 = arith.constant 0 : i32
    %384 = vector.broadcast %c0_i32_160 : i32 to vector<8x512xi32>
    %385 = arith.cmpi sge, %383, %384 : vector<8x512xi32>
    %c1_i32_161 = arith.constant 1 : i32
    %386 = vector.broadcast %c1_i32_161 : i32 to vector<8x512xi32>
    %387 = arith.addi %237, %386 : vector<8x512xi32>
    %c16_i32_162 = arith.constant 16 : i32
    %388 = vector.broadcast %c16_i32_162 : i32 to vector<8x512xi32>
    %389 = arith.cmpi slt, %387, %388 : vector<8x512xi32>
    %390 = arith.andi %385, %389 : vector<8x512xi1>
    %c-1_i32_163 = arith.constant -1 : i32
    %391 = vector.broadcast %c-1_i32_163 : i32 to vector<8x512xi32>
    %392 = arith.addi %233, %391 : vector<8x512xi32>
    %c0_i32_164 = arith.constant 0 : i32
    %393 = vector.broadcast %c0_i32_164 : i32 to vector<8x512xi32>
    %394 = arith.cmpi sge, %392, %393 : vector<8x512xi32>
    %395 = arith.andi %390, %394 : vector<8x512xi1>
    %c-1_i32_165 = arith.constant -1 : i32
    %396 = vector.broadcast %c-1_i32_165 : i32 to vector<8x512xi32>
    %397 = arith.addi %233, %396 : vector<8x512xi32>
    %c16_i32_166 = arith.constant 16 : i32
    %398 = vector.broadcast %c16_i32_166 : i32 to vector<8x512xi32>
    %399 = arith.cmpi slt, %397, %398 : vector<8x512xi32>
    %400 = arith.andi %395, %399 : vector<8x512xi1>
    %cst_167 = arith.constant 0.000000e+00 : f32
    %401 = vector.broadcast %cst_167 : f32 to vector<8x512xf32>
    %402 = arith.select %400, %381, %401 : vector<8x512xi1>, vector<8x512xf32>
    %403 = vector.extract_strided_slice %228 {offsets = [0, 16], sizes = [8, 496], strides = [1, 1]} : vector<8x512xf32> to vector<8x496xf32>
    %cst_168 = arith.constant 0.000000e+00 : f32
    %404 = vector.broadcast %cst_168 : f32 to vector<8x16xf32>
    %405 = tpu.concatenate %403, %404 in 1 : vector<8x496xf32>, vector<8x16xf32> -> vector<8x512xf32>
    %c1_i32_169 = arith.constant 1 : i32
    %406 = vector.broadcast %c1_i32_169 : i32 to vector<8x512xi32>
    %407 = arith.addi %237, %406 : vector<8x512xi32>
    %c0_i32_170 = arith.constant 0 : i32
    %408 = vector.broadcast %c0_i32_170 : i32 to vector<8x512xi32>
    %409 = arith.cmpi sge, %407, %408 : vector<8x512xi32>
    %c1_i32_171 = arith.constant 1 : i32
    %410 = vector.broadcast %c1_i32_171 : i32 to vector<8x512xi32>
    %411 = arith.addi %237, %410 : vector<8x512xi32>
    %c16_i32_172 = arith.constant 16 : i32
    %412 = vector.broadcast %c16_i32_172 : i32 to vector<8x512xi32>
    %413 = arith.cmpi slt, %411, %412 : vector<8x512xi32>
    %414 = arith.andi %409, %413 : vector<8x512xi1>
    %c0_i32_173 = arith.constant 0 : i32
    %415 = vector.broadcast %c0_i32_173 : i32 to vector<8x512xi32>
    %416 = arith.addi %233, %415 : vector<8x512xi32>
    %c0_i32_174 = arith.constant 0 : i32
    %417 = vector.broadcast %c0_i32_174 : i32 to vector<8x512xi32>
    %418 = arith.cmpi sge, %416, %417 : vector<8x512xi32>
    %419 = arith.andi %414, %418 : vector<8x512xi1>
    %c0_i32_175 = arith.constant 0 : i32
    %420 = vector.broadcast %c0_i32_175 : i32 to vector<8x512xi32>
    %421 = arith.addi %233, %420 : vector<8x512xi32>
    %c16_i32_176 = arith.constant 16 : i32
    %422 = vector.broadcast %c16_i32_176 : i32 to vector<8x512xi32>
    %423 = arith.cmpi slt, %421, %422 : vector<8x512xi32>
    %424 = arith.andi %419, %423 : vector<8x512xi1>
    %cst_177 = arith.constant 0.000000e+00 : f32
    %425 = vector.broadcast %cst_177 : f32 to vector<8x512xf32>
    %426 = arith.select %424, %405, %425 : vector<8x512xi1>, vector<8x512xf32>
    %427 = vector.extract_strided_slice %228 {offsets = [0, 17], sizes = [8, 495], strides = [1, 1]} : vector<8x512xf32> to vector<8x495xf32>
    %cst_178 = arith.constant 0.000000e+00 : f32
    %428 = vector.broadcast %cst_178 : f32 to vector<8x17xf32>
    %429 = tpu.concatenate %427, %428 in 1 : vector<8x495xf32>, vector<8x17xf32> -> vector<8x512xf32>
    %c1_i32_179 = arith.constant 1 : i32
    %430 = vector.broadcast %c1_i32_179 : i32 to vector<8x512xi32>
    %431 = arith.addi %237, %430 : vector<8x512xi32>
    %c0_i32_180 = arith.constant 0 : i32
    %432 = vector.broadcast %c0_i32_180 : i32 to vector<8x512xi32>
    %433 = arith.cmpi sge, %431, %432 : vector<8x512xi32>
    %c1_i32_181 = arith.constant 1 : i32
    %434 = vector.broadcast %c1_i32_181 : i32 to vector<8x512xi32>
    %435 = arith.addi %237, %434 : vector<8x512xi32>
    %c16_i32_182 = arith.constant 16 : i32
    %436 = vector.broadcast %c16_i32_182 : i32 to vector<8x512xi32>
    %437 = arith.cmpi slt, %435, %436 : vector<8x512xi32>
    %438 = arith.andi %433, %437 : vector<8x512xi1>
    %c1_i32_183 = arith.constant 1 : i32
    %439 = vector.broadcast %c1_i32_183 : i32 to vector<8x512xi32>
    %440 = arith.addi %233, %439 : vector<8x512xi32>
    %c0_i32_184 = arith.constant 0 : i32
    %441 = vector.broadcast %c0_i32_184 : i32 to vector<8x512xi32>
    %442 = arith.cmpi sge, %440, %441 : vector<8x512xi32>
    %443 = arith.andi %438, %442 : vector<8x512xi1>
    %c1_i32_185 = arith.constant 1 : i32
    %444 = vector.broadcast %c1_i32_185 : i32 to vector<8x512xi32>
    %445 = arith.addi %233, %444 : vector<8x512xi32>
    %c16_i32_186 = arith.constant 16 : i32
    %446 = vector.broadcast %c16_i32_186 : i32 to vector<8x512xi32>
    %447 = arith.cmpi slt, %445, %446 : vector<8x512xi32>
    %448 = arith.andi %443, %447 : vector<8x512xi1>
    %cst_187 = arith.constant 0.000000e+00 : f32
    %449 = vector.broadcast %cst_187 : f32 to vector<8x512xf32>
    %450 = arith.select %448, %429, %449 : vector<8x512xi1>, vector<8x512xf32>
    %451 = tpu.concatenate %261, %285, %309, %333, %354, %378, %402, %426, %450 in 0 : vector<8x512xf32>, vector<8x512xf32>, vector<8x512xf32>, vector<8x512xf32>, vector<8x512xf32>, vector<8x512xf32>, vector<8x512xf32>, vector<8x512xf32>, vector<8x512xf32> -> vector<72x512xf32>
    %cst_188 = arith.constant dense<0.000000e+00> : vector<8x512xf32>
    %452 = tpu.matmul %229, %451, %cst_188 {dimension_numbers = #tpu.dot_dimension_numbers<[1], [0], [0], [1], [0, 0, 1, 1], [], []>} : vector<8x72xf32>, vector<72x512xf32>, vector<8x512xf32> -> vector<8x512xf32>
    %453 = vector.broadcast %230 : vector<8x1xf32> to vector<8x512xf32>
    %454 = arith.addf %452, %453 : vector<8x512xf32>
    %cst_189 = arith.constant 0.000000e+00 : f32
    %455 = vector.broadcast %cst_189 : f32 to vector<8x512xf32>
    %456 = arith.maximumf %454, %455 : vector<8x512xf32>
    %c0_190 = arith.constant 0 : index
    %c0_191 = arith.constant 0 : index
    %457 = vector.load %arg5[%c0_190, %c0_191] : memref<8x512xf32, #tpu.memory_space<vmem>>, vector<8x512xf32>
    tpu.vector_store %arg5[%c0_190, %c0_191], %456 {strides = array<i32>} : memref<8x512xf32, #tpu.memory_space<vmem>>, vector<8x512xf32>,
    return
  }
}

</mosaic_0001>

<bundles_post_ra>
// kernel: encoder_forward.1
= control target key start
LH: loop header
LB: loop body
LE: loop exit
PB: predicated region body
PF: predicated region fallthrough
CT: control target
= control target key end

     0   :  { %s941_s22 = smov 111   ;;  %s942_s27 = smov 112   ;;  %v947_v4 = vmov 0.0   ;;  %v949_v5 = vmov 0   ;;  %v26_v7 = vlaneseq  ;;  %v1753_v29 = vmov 0  ;;  %s1706_s0 = inlined_call_operand.vmem [shape: f32[8,512], index: 0, kind: input, shape index: {}]   ;;  %s1707_s2 = inlined_call_operand.vmem [shape: f32[8,1], index: 2, kind: input, shape index: {}]   ;;  %s1708_s1 = inlined_call_operand.vmem [shape: f32[8,72], index: 1, kind: input, shape index: {}]   ;;  %s1709_s4 = inlined_call_operand.vmem [shape: f32[8,1], index: 4, kind: input, shape index: {}]   ;;  %s1710_s3 = inlined_call_operand.vmem [shape: f32[8,72], index: 3, kind: input, shape index: {}]   ;;  %s1711_s5 = inlined_call_operand.vmem [shape: f32[8,512], index: 5, kind: output, shape index: {}]  }
   0x1   :  { %v984_v0 = vld [vmem:[%s1706_s0 + $0x18] sm:$0xff]  ;;  %v989_v1 = vld [vmem:[%s1706_s0 + $0x8] sm:$0xff]  ;;  %v998_v2 = vld [vmem:[%s1706_s0 + $0x10] sm:$0xff]  ;;  %s944_s28 = smov 127   ;;  %s945_s29 = smov 1   ;;  %440 = vmatprep.mubr.f32.mxu0 %v947_v4  ;;  %511 = vmatprep.mubr.f32.mxu1 %v947_v4  ;;  %vm1712_vm8 = vcmask 908288  }
   0x2   :  { %344 = vrot.lane.b32.xlu1 %v984_v0, %s941_s22  ;;  %340 = vrot.lane.b32.xlu0 %v989_v1, %s941_s22  ;;  %v1003_v3 = vld [vmem:[%s1706_s0] sm:$0xff]  ;;  %s943_s0 = smov 113   ;;  %s946_s30 = smov 15   ;;  %v1070_v8 = vand.u32 127, %v26_v7  ;;  %v1757_v34 = vmov 0  ;;  %v1759_v37 = vmov 0 }
   0x3   :  { %s948_s6 = smov 16   ;;  %940 = vset.pattern.permute.xlu0 %v949_v5  ;;  %s950_s7 = smov 17   ;;  %v25_v6 = vld [vmem:[%s1707_s2] sm:$0xff]  ;;  %v1761_v39 = vmov 0  ;;  %v1763_v40 = vmov 0  ;;  %v1767_v44 = vmov 0 }
   0x4   :  { %v1073_v9 = vadd.s32 384, %v1070_v8  ;;  %v28_v11 = vadd.s32 128, %v1070_v8  ;;  %v1078_v12 = vadd.s32 256, %v1070_v8  ;;  %v35_v16 = vshra.s32 %v1070_v8, 4 }
   0x5   :  { %v31_v27 = vand.u32 15, %v1070_v8  ;;  %v1769_v60 = vmov 0  ;;  %v1771_v5 = vmov 0  ;;  %v1775_v7 = vmov 0 }
   0x6   :  { %342 = vrot.lane.b32.xlu0 %v998_v2, %s941_s22  ;;  %338 = vrot.lane.b32.xlu1 %v1003_v3, %s941_s22  ;;  %v38_v10 = vshra.s32 %v1073_v9, 4  ;;  %v36_v14 = vshra.s32 %v28_v11, 4  ;;  %v37_v15 = vshra.s32 %v1078_v12, 4  ;;  %v34_v17 = vand.u32 15, %v1073_v9 }
   0x7   :  { %v1090_v21 = vand.u32 15, %v35_v16  ;;  %v32_v23 = vand.u32 15, %v28_v11  ;;  %v33_v25 = vand.u32 15, %v1078_v12  ;;  %v1108_v32 = vadd.s32 1, %v31_v27 }
   0x8   :  { %v1080_v13 = vand.u32 15, %v38_v10  ;;  %v1086_v19 = vand.u32 15, %v36_v14  ;;  %v1088_v20 = vand.u32 15, %v37_v15  ;;  %v1092_v22 = vadd.s32 1, %v34_v17 }
   0x9   :  { %v281_v28 = vadd.s32 1, %v1090_v21  ;;  %v1104_v30 = vadd.s32 1, %v32_v23  ;;  %v1106_v31 = vadd.s32 1, %v33_v25  ;;  %v1169_v50 = vadd.s32 4294967295, %v32_v23 }
   0xa   :  { %311 = vrot.lane.b32.xlu0 %v989_v1, %s942_s27  ;;  %313 = vrot.lane.b32.xlu1 %v998_v2, %s942_s27  ;;  %v284_v18 = vadd.s32 1, %v1080_v13  ;;  %v282_v24 = vadd.s32 1, %v1086_v19  ;;  %v283_v26 = vadd.s32 1, %v1088_v20  ;;  %vm1715_vm2 = vcmp.lt.s32.totalorder %v1092_v22, 16 }
   0xb   :  { %vm285_vm10 = vcmp.ge.s32.totalorder %v281_v28, 0  ;;  %vm289_vm11 = vcmp.lt.s32.totalorder %v281_v28, 16  ;;  %vm1717_vm12 = vcmp.lt.s32.totalorder %v1104_v30, 16  ;;  %vm1713_vm14 = vcmp.lt.s32.totalorder %v1106_v31, 16 }
   0xc   :  { %vm288_vm0 = vcmp.ge.s32.totalorder %v284_v18, 0  ;;  %vm292_vm1 = vcmp.lt.s32.totalorder %v284_v18, 16  ;;  %vm286_vm4 = vcmp.ge.s32.totalorder %v282_v24, 0  ;;  %vm290_vm5 = vcmp.lt.s32.totalorder %v282_v24, 16 }
   0xd   :  { %vm1100_vm3 = vmand %vm288_vm0, %vm292_vm1  ;;  %vm287_vm6 = vcmp.ge.s32.totalorder %v283_v26, 0  ;;  %vm291_vm7 = vcmp.lt.s32.totalorder %v283_v26, 16  ;;  %vm1716_vm0 = vcmp.lt.s32.totalorder %v1108_v32, 16  ;;  %v1174_v52 = vadd.s32 4294967295, %v31_v27 }
   0xe   :  { %315 = vrot.lane.b32.xlu0 %v984_v0, %s942_s27  ;;  %309 = vrot.lane.b32.xlu1 %v1003_v3, %s942_s27  ;;  %v1754_v29 = vsel %vm1100_vm3, 4294967295, %v1753_v29  ;;  %vm1114_vm9 = vmand %vm1100_vm3, %vm1715_vm2  ;;  %v1176_v53 = vadd.s32 4294967295, %v34_v17  ;;  %v1182_v59 = vadd.s32 4294967295, %v33_v25  ;;  %vm200_vm2 = vcmp.ge.s32.totalorder %v1086_v19, 0 }
   0xf   :  { %vm1119_vm13 = vmand %vm286_vm4, %vm290_vm5  ;;  %v1777_v10 = vmov 0  ;;  %v1783_v15 = vmov 0  ;;  %v1785_v16 = vmov 0  ;;  %v1788_v23 = vmov 0 }
  0x10   :  { %v1758_v34 = vsel %vm1119_vm13, 4294967295, %v1757_v34  ;;  %vm1124_vm15 = vmand %vm287_vm6, %vm291_vm7  ;;  %vm1714_vm7 = vcmask 916480   ;;  %v1791_v25 = vmov 0  ;;  %v1794_v26 = vmov 0 }
  0x11   :  { %v1760_v37 = vsel %vm1124_vm15, 4294967295, %v1759_v37  ;;  %vm1130_vm1 = vmand %vm285_vm10, %vm289_vm11  ;;  %vm1718_vm10 = vcmp.ge.s32.totalorder %v1169_v50, 0  ;;  %vm1720_vm11 = vcmask 924672   ;;  %v1797_v27 = vmov 0 }
  0x12   :  { %266 = vrot.lane.b32.xlu0 %v989_v1, %s943_s0  ;;  %268 = vrot.lane.b32.xlu1 %v998_v2, %s943_s0  ;;  %v1762_v39 = vsel %vm1130_vm1, 4294967295, %v1761_v39  ;;  %vm1140_vm4 = vmand %vm1119_vm13, %vm1717_vm12 }
  0x13   :  { %v1764_v40 = vsel %vm1140_vm4, 4294967295, %v1763_v40  ;;  %vm1148_vm5 = vmand %vm1124_vm15, %vm1713_vm14 }
  0x14   :  { %vm1156_vm6 = vmand %vm1130_vm1, %vm1716_vm0  ;;  %vm204_vm0 = vcmp.lt.s32.totalorder %v1086_v19, 16 }
  0x15   :  { %v1768_v44 = vsel %vm1156_vm6, 4294967295, %v1767_v44  ;;  %vm1195_vm14 = vmand %vm1119_vm13, %vm1718_vm10  ;;  %vm1727_vm10 = vcmp.ge.s32.totalorder %v1182_v59, 0 }
  0x16   :  { %270 = vrot.lane.b32.xlu0 %v984_v0, %s943_s0  ;;  %264 = vrot.lane.b32.xlu1 %v1003_v3, %s943_s0  ;;  %v1770_v60 = vsel %vm1195_vm14, 4294967295, %v1769_v60 }
  0x1a   :  { %237 = vrot.lane.b32.xlu0 %v989_v1, %s944_s28  ;;  %239 = vrot.lane.b32.xlu1 %v998_v2, %s944_s28 }
  0x1e   :  { %241 = vrot.lane.b32.xlu0 %v984_v0, %s944_s28  ;;  %235 = vrot.lane.b32.xlu1 %v1003_v3, %s944_s28 }
  0x22   :  { %182 = vrot.lane.b32.xlu0 %v1003_v3, %s945_s29  ;;  %184 = vrot.lane.b32.xlu1 %v989_v1, %s945_s29 }
  0x26   :  { %186 = vrot.lane.b32.xlu0 %v998_v2, %s945_s29  ;;  %188 = vrot.lane.b32.xlu1 %v984_v0, %s945_s29 }
  0x2a   :  { %141 = vrot.lane.b32.xlu0 %v1003_v3, %s946_s30  ;;  %143 = vrot.lane.b32.xlu1 %v989_v1, %s946_s30 }
  0x2e   :  { %145 = vrot.lane.b32.xlu0 %v998_v2, %s946_s30  ;;  %147 = vrot.lane.b32.xlu1 %v984_v0, %s946_s30 }
  0x32   :  { %104 = vrot.lane.b32.xlu0 %v1003_v3, %s948_s6  ;;  %106 = vrot.lane.b32.xlu1 %v989_v1, %s948_s6 }
  0x36   :  { %108 = vrot.lane.b32.xlu0 %v998_v2, %s948_s6  ;;  %110 = vrot.lane.b32.xlu1 %v984_v0, %s948_s6 }
  0x3a   :  { %47 = vrot.lane.b32.xlu0 %v1003_v3, %s950_s7  ;;  %49 = vrot.lane.b32.xlu1 %v989_v1, %s950_s7 }
  0x3e   :  { %51 = vrot.lane.b32.xlu0 %v998_v2, %s950_s7  ;;  %53 = vrot.lane.b32.xlu1 %v984_v0, %s950_s7 }
  0x42   :  { %369 = vperm.xlu0 %940, %v25_v6   ;;  %v1773_v6 = vmov 0 }
  0x74   :  { %v345_v35 = vpop.permute.xlu1 %344  ;;  %v341_v36 = vpop.permute.xlu0 %340 }
  0x75   :  { %v354_v38 = vsel %vm1712_vm8, %v345_v35, 0.0 }
  0x76   :  { %873 = vmatprep.subr.msk.mxu1 %vm1114_vm9, %v354_v38  ;;  %v65_v38 = vadd.s32 4294967295, %v1086_v19  ;;  %v1805_v19 = vmov 0 }
  0x78   :  { %v343_v42 = vpop.permute.xlu0 %342  ;;  %v339_v43 = vpop.permute.xlu1 %338 }
  0x79   :  { %v348_v45 = vsel %vm1712_vm8, %v341_v36, %v343_v42  ;;  %v349_v46 = vsel %vm1712_vm8, %v343_v42, %v345_v35  ;;  %v347_v47 = vsel %vm1712_vm8, %v339_v43, %v341_v36  ;;  %vm1721_vm8 = vcmp.ge.s32.totalorder %v1174_v52, 0 }
  0x7a   :  { %854 = vmatprep.subr.msk.mxu0 %vm1140_vm4, %v348_v45  ;;  %874 = vmatpush1.msk.msra.mxu1 %vm1148_vm5, %v349_v46  ;;  %vm1207_vm12 = vmand %vm1130_vm1, %vm1721_vm8  ;;  %vm206_vm4 = vcmp.lt.s32.totalorder %v1080_v13, 16  ;;  %v1800_v36 = vmov 0  ;;  %v64_v42 = vadd.s32 4294967295, %v1090_v21 }
  0x7b   :  { %855 = vmatpush1.msk.msra.mxu0 %vm1156_vm6, %v347_v47  ;;  %v1772_v5 = vsel %vm1207_vm12, 4294967295, %v1771_v5  ;;  %vm1230_vm8 = vmand %vm1124_vm15, %vm1727_vm10  ;;  %vm1787_vm10 = vcmp.ge.s32.totalorder %v1080_v13, 0 }
  0x7c   :  { %v312_v48 = vpop.permute.xlu0 %311  ;;  %v314_v49 = vpop.permute.xlu1 %313  ;;  %v1778_v10 = vsel %vm1230_vm8, 4294967295, %v1777_v10 }
  0x7d   :  { %v319_v51 = vsel %vm1714_vm7, %v312_v48, %v314_v49 }
  0x7e   :  { %856 = vmatprep.subr.msk.mxu0 %vm1119_vm13, %v319_v51  ;;  %v66_v51 = vadd.s32 4294967295, %v1088_v20 }
  0x80   :  { %v316_v54 = vpop.permute.xlu0 %315  ;;  %v310_v55 = vpop.permute.xlu1 %309 }
  0x81   :  { %v320_v56 = vsel %vm1714_vm7, %v314_v49, %v316_v54  ;;  %v325_v57 = vsel %vm1714_vm7, %v316_v54, 0.0  ;;  %v318_v58 = vsel %vm1714_vm7, %v310_v55, %v312_v48  ;;  %vm1723_vm7 = vcmp.ge.s32.totalorder %v1176_v53, 0 }
  0x82   :  { %857 = vmatpush1.msk.msra.mxu0 %vm1130_vm1, %v318_v58  ;;  %875 = vmatprep.subr.msk.mxu1 %vm1100_vm3, %v325_v57  ;;  %vm1218_vm13 = vmand %vm1100_vm3, %vm1723_vm7  ;;  %vm203_vm7 = vcmp.lt.s32.totalorder %v1090_v21, 16  ;;  %v1818_v54 = vmov 0 }
  0x83   :  { %876 = vmatpush1.msk.msra.mxu1 %vm1124_vm15, %v320_v56  ;;  %v1774_v6 = vsel %vm1218_vm13, 4294967295, %v1773_v6  ;;  %vm1782_vm15 = vcmp.lt.s32.totalorder %v1104_v30, 16  ;;  %v1820_v56 = vmov 0 }
  0x84   :  { %v267_v61 = vpop.permute.xlu0 %266  ;;  %v269_v62 = vpop.permute.xlu1 %268 }
  0x85   :  { %v274_v63 = vsel %vm1720_vm11, %v267_v61, %v269_v62  ;;  %vm1222_vm11 = vmand %vm200_vm2, %vm204_vm0  ;;  %vm1779_vm2 = vcmask 924672  }
  0x86   :  { %858 = vmatprep.subr.msk.mxu0 %vm1195_vm14, %v274_v63  ;;  %v1776_v7 = vsel %vm1222_vm11, 4294967295, %v1775_v7  ;;  %vm199_vm14 = vcmp.ge.s32.totalorder %v1090_v21, 0  ;;  %vm1780_vm0 = vmmov %vm1779_vm2 }
  0x87   :  { %vm1781_vm6 = vmmov %vm1780_vm0 }
  0x88   :  { %v271_v8 = vpop.permute.xlu0 %270  ;;  %v265_v9 = vpop.permute.xlu1 %264  ;;  %vm1249_vm1 = vmand %vm1222_vm11, %vm1782_vm15  ;;  %vm1790_vm15 = vcmask 1039360  }
  0x89   :  { %v275_v11 = vsel %vm1779_vm2, %v269_v62, %v271_v8  ;;  %v280_v12 = vsel %vm1780_vm0, %v271_v8, 0.0  ;;  %v273_v14 = vsel %vm1781_vm6, %v265_v9, %v267_v61  ;;  %v1784_v15 = vsel %vm1249_vm1, 4294967295, %v1783_v15  ;;  %vm1257_vm0 = vmand %vm199_vm14, %vm203_vm7 }
  0x8a   :  { %859 = vmatpush1.msk.msra.mxu0 %vm1207_vm12, %v273_v14  ;;  %877 = vmatprep.subr.msk.mxu1 %vm1218_vm13, %v280_v12  ;;  %vm201_vm2 = vcmp.ge.s32.totalorder %v1088_v20, 0  ;;  %vm205_vm6 = vcmp.lt.s32.totalorder %v1088_v20, 16  ;;  %v1786_v16 = vsel %vm1257_vm0, 4294967295, %v1785_v16  ;;  %vm1263_vm12 = vmand %vm1787_vm10, %vm206_vm4  ;;  %vm1793_vm14 = vcmp.lt.s32.totalorder %v1108_v32, 16 }
  0x8b   :  { %878 = vmatpush1.msk.msra.mxu1 %vm1230_vm8, %v275_v11  ;;  %v1789_v23 = vsel %vm1263_vm12, 4294967295, %v1788_v23  ;;  %vm1268_vm13 = vmand %vm201_vm2, %vm205_vm6  ;;  %vm1796_vm4 = vcmp.lt.s32.totalorder %v1092_v22, 16  ;;  %vm1799_vm2 = vcmp.lt.s32.totalorder %v1106_v31, 16 }
  0x8c   :  { %v238_v17 = vpop.permute.xlu0 %237  ;;  %v240_v18 = vpop.permute.xlu1 %239  ;;  %v1792_v25 = vsel %vm1268_vm13, 4294967295, %v1791_v25  ;;  %vm1278_vm7 = vmand %vm1257_vm0, %vm1793_vm14 }
  0x8d   :  { %v245_v24 = vsel %vm1790_vm15, %v238_v17, %v240_v18  ;;  %v1795_v26 = vsel %vm1278_vm7, 4294967295, %v1794_v26  ;;  %vm1286_vm10 = vmand %vm1263_vm12, %vm1796_vm4 }
  0x8e   :  { %860 = vmatprep.subr.msk.mxu0 %vm1249_vm1, %v245_v24  ;;  %v1798_v27 = vsel %vm1286_vm10, 4294967295, %v1797_v27  ;;  %vm1294_vm6 = vmand %vm1268_vm13, %vm1799_vm2  ;;  %vm72_vm1 = vcmp.lt.s32.totalorder %v64_v42, 16 }
  0x8f   :  { %v1801_v36 = vsel %vm1294_vm6, 4294967295, %v1800_v36  ;;  %vm1802_vm14 = vmmov %vm1790_vm15 }
  0x90   :  { %v242_v28 = vpop.permute.xlu0 %241  ;;  %v236_v35 = vpop.permute.xlu1 %235  ;;  %vm1803_vm4 = vmmov %vm1802_vm14 }
  0x91   :  { %v246_v43 = vsel %vm1790_vm15, %v240_v18, %v242_v28  ;;  %v251_v45 = vsel %vm1802_vm14, %v242_v28, 0.0  ;;  %v244_v46 = vsel %vm1803_vm4, %v236_v35, %v238_v17  ;;  %vm1804_vm15 = vcmp.ge.s32.totalorder %v1169_v50, 0 }
  0x92   :  { %861 = vmatpush1.msk.msra.mxu0 %vm1278_vm7, %v244_v46  ;;  %879 = vmatprep.subr.msk.mxu1 %vm1286_vm10, %v251_v45  ;;  %vm1316_vm14 = vmand %vm1222_vm11, %vm1804_vm15  ;;  %vm1807_vm4 = vcmp.ge.s32.totalorder %v1174_v52, 0  ;;  %vm69_vm15 = vcmp.ge.s32.totalorder %v65_v38, 0  ;;  %vm68_vm10 = vcmp.ge.s32.totalorder %v64_v42, 0  ;;  %v1845_v46 = vmov 0 }
  0x93   :  { %880 = vmatpush1.msk.msra.mxu1 %vm1294_vm6, %v246_v43  ;;  %862 = vmatprep.subr.msk.mxu0 %vm1222_vm11, %v989_v1  ;;  %v1806_v19 = vsel %vm1316_vm14, 4294967295, %v1805_v19  ;;  %vm1327_vm2 = vmand %vm1257_vm0, %vm1807_vm4  ;;  %v1808_v1 = vmov 0  ;;  %vm73_vm6 = vcmp.lt.s32.totalorder %v65_v38, 16  ;;  %vm1810_vm11 = vcmask 7168  }
  0x94   :  { %v183_v21 = vpop.permute.xlu0 %182  ;;  %v185_v47 = vpop.permute.xlu1 %184  ;;  %863 = vmatpush1.msk.msra.mxu0 %vm1257_vm0, %v1003_v3  ;;  %v1809_v1 = vsel %vm1327_vm2, 4294967295, %v1808_v1  ;;  %881 = vmatprep.subr.msk.mxu1 %vm1263_vm12, %v984_v0  ;;  %vm1811_vm7 = vmmov %vm1810_vm11  ;;  %vm1812_vm4 = vcmp.ge.s32.totalorder %v1176_v53, 0  ;;  %v1813_v3 = vmov 0  ;;  %v67_v0 = vadd.s32 4294967295, %v1080_v13 }
  0x95   :  { %v198_v48 = vsel %vm1810_vm11, 0.0, %v183_v21  ;;  %v191_v49 = vsel %vm1811_vm7, %v183_v21, %v185_v47  ;;  %882 = vmatpush1.msk.msra.mxu1 %vm1268_vm13, %v998_v2  ;;  %vm1343_vm0 = vmand %vm1263_vm12, %vm1812_vm4  ;;  %vm1815_vm11 = vcmp.ge.s32.totalorder %v1182_v59, 0 }
  0x96   :  { %v1814_v3 = vsel %vm1343_vm0, 4294967295, %v1813_v3  ;;  %864 = vmatprep.subr.msk.mxu0 %vm1316_vm14, %v191_v49  ;;  %vm1354_vm7 = vmand %vm1268_vm13, %vm1815_vm11  ;;  %vm1822_vm14 = vcmask 7168   ;;  %vm71_vm13 = vcmp.ge.s32.totalorder %v67_v0, 0  ;;  %vm75_vm8 = vcmp.lt.s32.totalorder %v67_v0, 16  ;;  %v24_v0 = vld [vmem:[%s1708_s1] sm:$0xff] }
  0x97   :  { %865 = vmatpush1.msk.msra.mxu0 %vm1327_vm2, %v198_v48  ;;  %vm1361_vm4 = vmand %vm69_vm15, %vm73_vm6  ;;  %vm1824_vm6 = vcmp.lt.s32.totalorder %v1104_v30, 16  ;;  %v1848_v48 = vmov 0 }
  0x98   :  { %v1819_v54 = vsel %vm1361_vm4, 4294967295, %v1818_v54  ;;  %v187_v13 = vpop.permute.xlu0 %186  ;;  %v189_v55 = vpop.permute.xlu1 %188  ;;  %vm1365_vm12 = vmand %vm68_vm10, %vm72_vm1  ;;  %vm70_vm1 = vcmp.ge.s32.totalorder %v66_v51, 0  ;;  %vm74_vm10 = vcmp.lt.s32.totalorder %v66_v51, 16 }
  0x99   :  { %v1821_v56 = vsel %vm1365_vm12, 4294967295, %v1820_v56  ;;  %v192_v57 = vsel %vm1822_vm14, %v185_v47, %v187_v13  ;;  %vm1823_vm11 = vmmov %vm1822_vm14  ;;  %vm1827_vm14 = vcmp.lt.s32.totalorder %v1108_v32, 16 }
  0x9a   :  { %v193_v58 = vsel %vm1823_vm11, %v187_v13, %v189_v55  ;;  %vm1377_vm15 = vmand %vm1361_vm4, %vm1824_vm6  ;;  %vm1832_vm6 = vcmask 121856   ;;  %v1854_v55 = vmov 0 }
  0x9b   :  { %883 = vmatprep.subr.msk.mxu1 %vm1343_vm0, %v193_v58  ;;  %vm1387_vm11 = vmand %vm1365_vm12, %vm1827_vm14  ;;  %vm1836_vm14 = vcmp.lt.s32.totalorder %v1092_v22, 16 }
  0x9c   :  { %884 = vmatpush1.msk.msra.mxu1 %vm1354_vm7, %v192_v57  ;;  %v142_v30 = vpop.permute.xlu0 %141  ;;  %v144_v62 = vpop.permute.xlu1 %143  ;;  %vm1391_vm2 = vmand %vm71_vm13, %vm75_vm8  ;;  %vm1839_vm13 = vcmp.lt.s32.totalorder %v1106_v31, 16 }
  0x9d   :  { %v157_v8 = vsel %vm1832_vm6, 0.0, %v142_v30  ;;  %vm1833_vm0 = vmmov %vm1832_vm6 }
  0x9e   :  { %v150_v9 = vsel %vm1833_vm0, %v142_v30, %v144_v62  ;;  %vm1397_vm3 = vmand %vm70_vm1, %vm74_vm10 }
  0x9f   :  { %866 = vmatprep.subr.msk.mxu0 %vm1377_vm15, %v150_v9  ;;  %vm1409_vm8 = vmand %vm1391_vm2, %vm1836_vm14  ;;  %vm1746_vm14 = vcmask 138240  }
  0xa0   :  { %867 = vmatpush1.msk.msra.mxu0 %vm1387_vm11, %v157_v8  ;;  %v146_v12 = vpop.permute.xlu0 %145  ;;  %v148_v14 = vpop.permute.xlu1 %147  ;;  %vm1417_vm0 = vmand %vm1397_vm3, %vm1839_vm13  ;;  %vm1844_vm13 = vcmp.ge.s32.totalorder %v1169_v50, 0 }
  0xa1   :  { %vm1842_vm1 = vmmov %vm1832_vm6  ;;  %vm1744_vm6 = vcmask 130048  }
  0xa2   :  { %v151_v18 = vsel %vm1842_vm1, %v144_v62, %v146_v12  ;;  %vm1843_vm10 = vmmov %vm1842_vm1 }
  0xa3   :  { %v152_v22 = vsel %vm1843_vm10, %v146_v12, %v148_v14  ;;  %vm1443_vm1 = vmand %vm1361_vm4, %vm1844_vm13  ;;  %vm1847_vm10 = vcmp.ge.s32.totalorder %v1174_v52, 0  ;;  %vm1750_vm13 = vcmask 588800   ;;  %v1851_v52 = vmov 0 }
  0xa4   :  { %885 = vmatprep.subr.msk.mxu1 %vm1409_vm8, %v152_v22  ;;  %v105_v24 = vpop.permute.xlu0 %104  ;;  %v107_v28 = vpop.permute.xlu1 %106  ;;  %v1846_v46 = vsel %vm1443_vm1, 4294967295, %v1845_v46 }
  0xa5   :  { %886 = vmatpush1.msk.msra.mxu1 %vm1417_vm0, %v151_v18  ;;  %v120_v31 = vsel %vm1744_vm6, 0.0, %v105_v24  ;;  %v113_v35 = vsel %vm1744_vm6, %v105_v24, %v107_v28 }
  0xa6   :  { %868 = vmatprep.subr.msk.mxu0 %vm1361_vm4, %v113_v35 }
  0xa7   :  { %869 = vmatpush1.msk.msra.mxu0 %vm1365_vm12, %v120_v31  ;;  %v523_v31 = vld [vmem:[%s1709_s4] sm:$0xff] }
  0xa8   :  { %v109_v38 = vpop.permute.xlu0 %108  ;;  %v111_v42 = vpop.permute.xlu1 %110 }
  0xa9   :  { %v114_v43 = vsel %vm1744_vm6, %v107_v28, %v109_v38  ;;  %v115_v45 = vsel %vm1744_vm6, %v109_v38, %v111_v42  ;;  %vm1451_vm6 = vmand %vm1365_vm12, %vm1847_vm10  ;;  %vm1850_vm10 = vcmp.ge.s32.totalorder %v1176_v53, 0 }
  0xaa   :  { %887 = vmatprep.subr.msk.mxu1 %vm1391_vm2, %v115_v45  ;;  %v1849_v48 = vsel %vm1451_vm6, 4294967295, %v1848_v48  ;;  %vm1468_vm12 = vmand %vm1391_vm2, %vm1850_vm10 }
  0xab   :  { %888 = vmatpush1.msk.msra.mxu1 %vm1397_vm3, %v114_v43  ;;  %v1852_v52 = vsel %vm1468_vm12, 4294967295, %v1851_v52 }
  0xac   :  { %v48_v21 = vpop.permute.xlu0 %47  ;;  %v50_v47 = vpop.permute.xlu1 %49 }
  0xad   :  { %v63_v49 = vsel %vm1746_vm14, 0.0, %v48_v21  ;;  %v56_v50 = vsel %vm1746_vm14, %v48_v21, %v50_v47  ;;  %vm1853_vm14 = vcmp.ge.s32.totalorder %v1182_v59, 0 }
  0xae   :  { %870 = vmatprep.subr.msk.mxu0 %vm1443_vm1, %v56_v50  ;;  %vm1477_vm1 = vmand %vm1397_vm3, %vm1853_vm14  ;;  %vm1860_vm14 = vcmask 916480  }
  0xaf   :  { %871 = vmatpush1.msk.msra.mxu0 %vm1451_vm6, %v63_v49  ;;  %v1855_v55 = vsel %vm1477_vm1, 4294967295, %v1854_v55  ;;  %vm1856_vm6 = vcmask 138240   ;;  %vm1861_vm10 = vmmov %vm1860_vm14 }
  0xb0   :  { %v52_v51 = vpop.permute.xlu0 %51  ;;  %872 = vmatmul.mubr.msk.f32.vlgmr.msra.gmra.mxu0 %vm1750_vm13, %v24_v0  ;;  %v54_v13 = vpop.permute.xlu1 %53  ;;  %vm1857_vm4 = vmmov %vm1856_vm6 }
  0xb1   :  { %v57_v53 = vsel %vm1856_vm6, %v50_v47, %v52_v51  ;;  %v58_v57 = vsel %vm1857_vm4, %v52_v51, %v54_v13  ;;  %764 = vmatprep.mubr.f32.mxu0 %v947_v4  ;;  %vm1858_vm4 = vcmask 908288  }
  0xb2   :  { %889 = vmatprep.subr.msk.mxu1 %vm1468_vm12, %v58_v57  ;;  %vm1859_vm6 = vmmov %vm1858_vm4  ;;  %vm1870_vm12 = vnez %v1778_v10 }
  0xb3   :  { %890 = vmatpush1.msk.msra.mxu1 %vm1477_vm1, %v57_v53  ;;  %vm1866_vm1 = vmmov %vm1859_vm6 }
  0xb4   :  { %891 = vmatmul.mubr.msk.f32.vlgmr.msra.gmra.mxu1 %vm1750_vm13, %v24_v0  ;;  %vm1862_vm13 = vnez %v1754_v29 }
  0xb5   :  { %835 = vmatprep.mubr.f32.mxu1 %v947_v4 }
  0xbd   :  { %v370_v59 = vpop.permute.xlu0 %369 }
 0x170   :  { %v442_v58 = vpop.f32.mrf.mxu0 }
 0x171   :  { %v443_v30 = vadd.f32 %v442_v58, %v370_v59 }
 0x172   :  { %v444_v18 = vpop.f32.mrf.mxu0 }
 0x173   :  { %v1490_v62 = vmax.f32 %v443_v30, 0.0  ;;  %v445_v22 = vadd.f32 %v444_v18, %v370_v59 }
 0x174   :  { %v513_v8 = vpop.f32.mrf.mxu1 }
 0x175   :  { %v514_v9 = vadd.f32 %v513_v8, %v370_v59  ;;  %588 = vrot.lane.b32.xlu0 %v1490_v62, %s945_s29  ;;  %v1518_v28 = vmax.f32 %v445_v22, 0.0 }
 0x176   :  { %v515_v4 = vpop.f32.mrf.mxu1 }
 0x177   :  { %v1494_v12 = vmax.f32 %v514_v9, 0.0  ;;  %v516_v14 = vadd.f32 %v515_v4, %v370_v59 }
 0x179   :  { %592 = vrot.lane.b32.xlu0 %v1494_v12, %s945_s29  ;;  %676 = vrot.lane.b32.xlu1 %v1494_v12, %s941_s22  ;;  %v1512_v24 = vmax.f32 %v516_v14, 0.0 }
 0x17d   :  { %568 = vrot.lane.b32.xlu0 %v1490_v62, %s946_s30  ;;  %672 = vrot.lane.b32.xlu1 %v1490_v62, %s941_s22 }
 0x181   :  { %572 = vrot.lane.b32.xlu0 %v1494_v12, %s946_s30  ;;  %656 = vrot.lane.b32.xlu1 %v1494_v12, %s942_s27 }
 0x185   :  { %548 = vrot.lane.b32.xlu0 %v1490_v62, %s948_s6  ;;  %652 = vrot.lane.b32.xlu1 %v1490_v62, %s942_s27 }
 0x189   :  { %678 = vrot.lane.b32.xlu0 %v1512_v24, %s941_s22  ;;  %636 = vrot.lane.b32.xlu1 %v1494_v12, %s943_s0 }
 0x18d   :  { %654 = vrot.lane.b32.xlu0 %v1518_v28, %s942_s27  ;;  %632 = vrot.lane.b32.xlu1 %v1490_v62, %s943_s0 }
 0x191   :  { %658 = vrot.lane.b32.xlu0 %v1512_v24, %s942_s27  ;;  %616 = vrot.lane.b32.xlu1 %v1494_v12, %s944_s28 }
 0x195   :  { %634 = vrot.lane.b32.xlu0 %v1518_v28, %s943_s0  ;;  %612 = vrot.lane.b32.xlu1 %v1490_v62, %s944_s28 }
 0x199   :  { %638 = vrot.lane.b32.xlu0 %v1512_v24, %s943_s0  ;;  %674 = vrot.lane.b32.xlu1 %v1518_v28, %s941_s22 }
 0x19d   :  { %614 = vrot.lane.b32.xlu0 %v1518_v28, %s944_s28  ;;  %590 = vrot.lane.b32.xlu1 %v1518_v28, %s945_s29 }
 0x1a1   :  { %618 = vrot.lane.b32.xlu0 %v1512_v24, %s944_s28  ;;  %594 = vrot.lane.b32.xlu1 %v1512_v24, %s945_s29 }
 0x1a5   :  { %552 = vrot.lane.b32.xlu0 %v1494_v12, %s948_s6  ;;  %570 = vrot.lane.b32.xlu1 %v1518_v28, %s946_s30 }
 0x1a9   :  { %528 = vrot.lane.b32.xlu0 %v1490_v62, %s950_s7  ;;  %574 = vrot.lane.b32.xlu1 %v1512_v24, %s946_s30 }
 0x1ad   :  { %532 = vrot.lane.b32.xlu0 %v1494_v12, %s950_s7  ;;  %550 = vrot.lane.b32.xlu1 %v1518_v28, %s948_s6 }
 0x1b1   :  { %694 = vperm.xlu0 %940, %v523_v31   ;;  %554 = vrot.lane.b32.xlu1 %v1512_v24, %s948_s6 }
 0x1b5   :  { %530 = vrot.lane.b32.xlu1 %v1518_v28, %s950_s7 }
 0x1b9   :  { %534 = vrot.lane.b32.xlu1 %v1512_v24, %s950_s7 }
 0x1e7   :  { %v589_v35 = vpop.permute.xlu0 %588 }
 0x1eb   :  { %v1565_v38 = vpop.permute.xlu0 %592  ;;  %v677_v42 = vpop.permute.xlu1 %676 }
 0x1ef   :  { %v1567_v43 = vpop.permute.xlu0 %568  ;;  %v673_v45 = vpop.permute.xlu1 %672 }
 0x1f3   :  { %v1569_v21 = vpop.permute.xlu0 %572  ;;  %v657_v47 = vpop.permute.xlu1 %656 }
 0x1f7   :  { %v1571_v49 = vpop.permute.xlu0 %548  ;;  %v653_v50 = vpop.permute.xlu1 %652 }
 0x1fb   :  { %v679_v0 = vpop.permute.xlu0 %678  ;;  %v637_v51 = vpop.permute.xlu1 %636 }
 0x1fc   :  { %v682_v13 = vsel %vm1858_vm4, %v677_v42, %v679_v0  ;;  %v687_v53 = vsel %vm1859_vm6, %v679_v0, 0.0  ;;  %vm1863_vm4 = vnez %v1760_v37 }
 0x1fd   :  { %911 = vmatprep.subr.msk.mxu1 %vm1114_vm9, %v687_v53  ;;  %vm1864_vm9 = vcmask 924672  }
 0x1fe   :  { %912 = vmatpush1.msk.msra.mxu1 %vm1148_vm5, %v682_v13  ;;  %vm1865_vm5 = vmmov %vm1864_vm9 }
 0x1ff   :  { %v655_v57 = vpop.permute.xlu0 %654  ;;  %v633_v59 = vpop.permute.xlu1 %632 }
 0x200   :  { %v661_v29 = vsel %vm1861_vm10, %v655_v57, %v657_v47 }
 0x203   :  { %v659_v58 = vpop.permute.xlu0 %658  ;;  %v617_v30 = vpop.permute.xlu1 %616 }
 0x204   :  { %v662_v8 = vsel %vm1860_vm14, %v657_v47, %v659_v58  ;;  %v667_v9 = vsel %vm1861_vm10, %v659_v58, 0.0  ;;  %vm1867_vm14 = vnez %v1764_v40 }
 0x205   :  { %913 = vmatprep.subr.msk.mxu1 %vm1862_vm13, %v667_v9  ;;  %vm1868_vm13 = vnez %v1774_v6 }
 0x206   :  { %914 = vmatpush1.msk.msra.mxu1 %vm1863_vm4, %v662_v8  ;;  %vm1869_vm4 = vnez %v1768_v44 }
 0x207   :  { %v635_v4 = vpop.permute.xlu0 %634  ;;  %v613_v33 = vpop.permute.xlu1 %612 }
 0x20b   :  { %v639_v14 = vpop.permute.xlu0 %638  ;;  %v675_v18 = vpop.permute.xlu1 %674 }
 0x20c   :  { %v642_v41 = vsel %vm1864_vm9, %v637_v51, %v639_v14  ;;  %v647_v22 = vsel %vm1865_vm5, %v639_v14, 0.0  ;;  %v680_v31 = vsel %vm1859_vm6, %v673_v45, %v675_v18  ;;  %v681_v0 = vsel %vm1866_vm1, %v675_v18, %v677_v42  ;;  %vm1871_vm9 = vmmov %vm1861_vm10 }
 0x20d   :  { %892 = vmatprep.subr.msk.mxu0 %vm1867_vm14, %v681_v0  ;;  %915 = vmatprep.subr.msk.mxu1 %vm1868_vm13, %v647_v22  ;;  %v660_v37 = vsel %vm1871_vm9, %v653_v50, %v655_v57  ;;  %vm1872_vm5 = vnez %v1758_v34  ;;  %vm1873_vm1 = vcmask 924672   ;;  %vm1874_vm6 = vnez %v1762_v39 }
 0x20e   :  { %893 = vmatpush1.msk.msra.mxu0 %vm1869_vm4, %v680_v31  ;;  %916 = vmatpush1.msk.msra.mxu1 %vm1870_vm12, %v642_v41  ;;  %v641_v40 = vsel %vm1873_vm1, %v635_v4, %v637_v51  ;;  %vm1875_vm14 = vmmov %vm1873_vm1  ;;  %vm1876_vm13 = vnez %v1770_v60  ;;  %vm1877_vm10 = vcmask 1039360   ;;  %vm1878_vm12 = vnez %v1772_v5 }
 0x20f   :  { %v615_v13 = vpop.permute.xlu0 %614  ;;  %894 = vmatprep.subr.msk.mxu0 %vm1872_vm5, %v661_v29  ;;  %v591_v42 = vpop.permute.xlu1 %590  ;;  %v640_v6 = vsel %vm1875_vm14, %v633_v59, %v635_v4  ;;  %vm1879_vm4 = vmmov %vm1877_vm10  ;;  %vm1880_vm9 = vnez %v1784_v15  ;;  %vm1884_vm14 = vnez %v1776_v7 }
 0x210   :  { %895 = vmatpush1.msk.msra.mxu0 %vm1874_vm6, %v660_v37  ;;  %v621_v44 = vsel %vm1877_vm10, %v615_v13, %v617_v30  ;;  %v620_v10 = vsel %vm1879_vm4, %v613_v33, %v615_v13  ;;  %vm1881_vm5 = vmmov %vm1879_vm4  ;;  %vm1883_vm6 = vnez %v1795_v26  ;;  %vm1886_vm10 = vcmask 7168  }
 0x211   :  { %896 = vmatprep.subr.msk.mxu0 %vm1876_vm13, %v641_v40  ;;  %vm1882_vm1 = vmmov %vm1879_vm4  ;;  %vm1885_vm13 = vnez %v1798_v27  ;;  %v596_v60 = vsel %vm1886_vm10, %v589_v35, %v591_v42  ;;  %vm1888_vm4 = vnez %v1801_v36 }
 0x212   :  { %897 = vmatpush1.msk.msra.mxu0 %vm1878_vm12, %v640_v6  ;;  %vm1887_vm12 = vnez %v1786_v16 }
 0x213   :  { %v619_v34 = vpop.permute.xlu0 %618  ;;  %898 = vmatprep.subr.msk.mxu0 %vm1880_vm9, %v621_v44  ;;  %v595_v45 = vpop.permute.xlu1 %594  ;;  %vm1889_vm9 = vmmov %vm1886_vm10  ;;  %vm1895_vm10 = vnez %v1792_v25 }
 0x214   :  { %v622_v39 = vsel %vm1881_vm5, %v617_v30, %v619_v34  ;;  %v627_v47 = vsel %vm1882_vm1, %v619_v34, 0.0  ;;  %899 = vmatpush1.msk.msra.mxu0 %vm1883_vm6, %v620_v10  ;;  %v603_v5 = vsel %vm1889_vm9, 0.0, %v589_v35  ;;  %vm1890_vm5 = vnez %v1806_v19  ;;  %vm1892_vm6 = vmmov %vm1889_vm9 }
 0x215   :  { %900 = vmatprep.subr.msk.mxu0 %vm1884_vm14, %v1518_v28  ;;  %917 = vmatprep.subr.msk.mxu1 %vm1885_vm13, %v627_v47  ;;  %vm1891_vm1 = vnez %v1789_v23  ;;  %v598_v15 = vsel %vm1892_vm6, %v1565_v38, %v595_v45  ;;  %vm1893_vm14 = vcmask 121856   ;;  %vm1894_vm13 = vnez %v1809_v1 }
 0x216   :  { %901 = vmatpush1.msk.msra.mxu0 %vm1887_vm12, %v1490_v62  ;;  %918 = vmatpush1.msk.msra.mxu1 %vm1888_vm4, %v622_v39  ;;  %vm1896_vm12 = vmmov %vm1893_vm14  ;;  %vm1898_vm9 = vnez %v1814_v3 }
 0x217   :  { %902 = vmatprep.subr.msk.mxu0 %vm1890_vm5, %v596_v60  ;;  %919 = vmatprep.subr.msk.mxu1 %vm1891_vm1, %v1512_v24  ;;  %v571_v7 = vpop.permute.xlu1 %570  ;;  %v583_v26 = vsel %vm1896_vm12, 0.0, %v1567_v43  ;;  %vm1897_vm4 = vmmov %vm1892_vm6  ;;  %v553_v19 = vpop.permute.xlu0 %552  ;;  %vm1904_vm6 = vnez %v1821_v56 }
 0x218   :  { %v576_v16 = vsel %vm1893_vm14, %v1567_v43, %v571_v7  ;;  %903 = vmatpush1.msk.msra.mxu0 %vm1894_vm13, %v603_v5  ;;  %920 = vmatpush1.msk.msra.mxu1 %vm1895_vm10, %v1494_v12  ;;  %v597_v23 = vsel %vm1897_vm4, %v591_v42, %v1565_v38  ;;  %vm1899_vm5 = vmmov %vm1896_vm12  ;;  %vm1909_vm10 = vnez %v1846_v46  ;;  %vm1910_vm12 = vnez %v1849_v48 }
 0x219   :  { %904 = vmatprep.subr.msk.mxu0 %vm1377_vm15, %v576_v16  ;;  %921 = vmatprep.subr.msk.mxu1 %vm1898_vm9, %v598_v15  ;;  %vm1900_vm1 = vmmov %vm1899_vm5  ;;  %vm1901_vm15 = vcmask 130048   ;;  %vm1914_vm9 = vnez %v1852_v52 }
 0x21a   :  { %905 = vmatpush1.msk.msra.mxu0 %vm1387_vm11, %v583_v26  ;;  %922 = vmatpush1.msk.msra.mxu1 %vm1354_vm7, %v597_v23  ;;  %v577_v36 = vsel %vm1900_vm1, %v571_v7, %v1569_v21  ;;  %vm1902_vm7 = vmmov %vm1901_vm15  ;;  %vm1903_vm11 = vnez %v1819_v54  ;;  %v522_v54 = vld [vmem:[%s1710_s3] sm:$0xff] }
 0x21b   :  { %v575_v25 = vpop.permute.xlu1 %574  ;;  %v563_v2 = vsel %vm1902_vm7, 0.0, %v1571_v49  ;;  %vm1905_vm14 = vmmov %vm1902_vm7  ;;  %v529_v32 = vpop.permute.xlu0 %528 }
 0x21c   :  { %v578_v27 = vsel %vm1899_vm5, %v1569_v21, %v575_v25  ;;  %vm1915_vm5 = vnez %v1855_v55 }
 0x21d   :  { %923 = vmatprep.subr.msk.mxu1 %vm1409_vm8, %v578_v27  ;;  %vm1906_vm8 = vmmov %vm1902_vm7 }
 0x21e   :  { %924 = vmatpush1.msk.msra.mxu1 %vm1417_vm0, %v577_v36  ;;  %vm1907_vm0 = vcmask 138240  }
 0x21f   :  { %v551_v1 = vpop.permute.xlu1 %550  ;;  %vm1908_vm13 = vmmov %vm1907_vm0  ;;  %v533_v63 = vpop.permute.xlu0 %532 }
 0x220   :  { %v556_v3 = vsel %vm1901_vm15, %v1571_v49, %v551_v1  ;;  %v557_v17 = vsel %vm1906_vm8, %v551_v1, %v553_v19  ;;  %v543_v56 = vsel %vm1908_vm13, 0.0, %v529_v32  ;;  %vm1913_vm4 = vmmov %vm1907_vm0 }
 0x221   :  { %906 = vmatprep.subr.msk.mxu0 %vm1903_vm11, %v556_v3 }
 0x222   :  { %907 = vmatpush1.msk.msra.mxu0 %vm1904_vm6, %v563_v2 }
 0x223   :  { %v555_v20 = vpop.permute.xlu1 %554 }
 0x224   :  { %v558_v61 = vsel %vm1905_vm14, %v553_v19, %v555_v20 }
 0x225   :  { %925 = vmatprep.subr.msk.mxu1 %vm1391_vm2, %v558_v61  ;;  %vm1911_vm2 = vcmask 588800  }
 0x226   :  { %926 = vmatpush1.msk.msra.mxu1 %vm1397_vm3, %v557_v17  ;;  %vm1912_vm3 = vmmov %vm1907_vm0 }
 0x227   :  { %v531_v62 = vpop.permute.xlu1 %530  ;;  %vm1916_vm1 = vmmov %vm1911_vm2 }
 0x228   :  { %v536_v12 = vsel %vm1907_vm0, %v529_v32, %v531_v62  ;;  %v537_v28 = vsel %vm1913_vm4, %v531_v62, %v533_v63 }
 0x229   :  { %908 = vmatprep.subr.msk.mxu0 %vm1909_vm10, %v536_v12 }
 0x22a   :  { %909 = vmatpush1.msk.msra.mxu0 %vm1910_vm12, %v543_v56 }
 0x22b   :  { %910 = vmatmul.mubr.msk.f32.vlgmr.msra.gmra.mxu0 %vm1911_vm2, %v522_v54  ;;  %v535_v11 = vpop.permute.xlu1 %534 }
 0x22c   :  { %v538_v24 = vsel %vm1912_vm3, %v533_v63, %v535_v11  ;;  %v695_v46 = vpop.permute.xlu0 %694 }
 0x22d   :  { %927 = vmatprep.subr.msk.mxu1 %vm1914_vm9, %v538_v24 }
 0x22e   :  { %928 = vmatpush1.msk.msra.mxu1 %vm1915_vm5, %v537_v28 }
 0x22f   :  { %929 = vmatmul.mubr.msk.f32.vlgmr.msra.gmra.mxu1 %vm1916_vm1, %v522_v54 }
 0x2eb   :  { %v766_v35 = vpop.f32.mrf.mxu0 }
 0x2ec   :  { %v767_v48 = vadd.f32 %v766_v35, %v695_v46 }
 0x2ed   :  { %v768_v38 = vpop.f32.mrf.mxu0 }
 0x2ee   :  { %v842_v43 = vmax.f32 %v767_v48, 0.0  ;;  %v769_v21 = vadd.f32 %v768_v38, %v695_v46 }
 0x2ef   :  { %v837_v49 = vpop.f32.mrf.mxu1 }
 0x2f0   :  { %846 = vst [vmem:[%s1711_s5] sm:$0xff] %v842_v43  ;;  %v843_v50 = vmax.f32 %v769_v21, 0.0  ;;  %v838_v51 = vadd.f32 %v837_v49, %v695_v46 }
 0x2f1   :  { %v839_v52 = vpop.f32.mrf.mxu1 }
 0x2f2   :  { %847 = vst [vmem:[%s1711_s5 + $0x8] sm:$0xff] %v843_v50  ;;  %v844_v55 = vmax.f32 %v838_v51, 0.0  ;;  %v840_v53 = vadd.f32 %v839_v52, %v695_v46 }
 0x2f4   :  { %848 = vst [vmem:[%s1711_s5 + $0x10] sm:$0xff] %v844_v55  ;;  %v845_v57 = vmax.f32 %v840_v53, 0.0 }
 0x2f6   :  { %849 = vst [vmem:[%s1711_s5 + $0x18] sm:$0xff] %v845_v57 }

</bundles_post_ra>
